<compile_context>
chip_gen: v6e
topology: v6e:2x2x1
jax: 0.10.0
libtpu: 0.0.40
codegen_flags: <defaults>
</compile_context>

<pallas_src>
import functools

import jax
import jax.numpy as jnp
from jax.experimental import pallas as pl
from jax.experimental.pallas import tpu as pltpu


def _layernorm(x, gamma, beta, eps=1e-5):
    mu = jnp.mean(x, axis=-1, keepdims=True)
    var = jnp.mean((x - mu) ** 2, axis=-1, keepdims=True)
    return (x - mu) * jax.lax.rsqrt(var + eps) * gamma + beta


def encoder_layers_kernel(
    x_ref,      # (Nb, S, E) f32  embedded input (value = key = query, as in Encoder.forward)
    mask_ref,   # (Nb, 1, S) i32  key mask (1 = attend, 0 = masked)
    wv_ref, wk_ref, wq_ref,   # (1, D, D) bf16  shared per-head weights (wq pre-scaled 1/sqrt(E))
    wo_ref,                   # (1, H, D, E) bf16  head-split fc_out weight
    bo_ref,                   # (1, 1, E) f32   fc_out bias
    g1_ref, be1_ref,          # (1, 1, E) f32   layernorm1 gamma / beta
    w1_ref,                   # (1, E, F) bf16  FFN weight 1 (pre-transposed)
    b1_ref,                   # (1, 1, F) f32
    w2_ref,                   # (1, F, E) bf16  FFN weight 2 (pre-transposed)
    b2_ref,                   # (1, 1, E) f32
    g2_ref, be2_ref,          # (1, 1, E) f32   layernorm2 gamma / beta
    out_ref,                  # (Nb, S, E) f32  output; also the layer-to-layer carry
    *, heads, block_q, block_kv,
):
    Nb, S, E = out_ref.shape
    H = heads
    D = E // H
    n_q = S // block_q
    n_kv = S // block_kv
    layer = pl.program_id(1)

    # First layer for this batch tile: seed the carry with the embedded input.
    @pl.when(layer == 0)
    def _():
        out_ref[...] = x_ref[...]

    wq = wq_ref[0]
    wk = wk_ref[0]
    wv = wv_ref[0]
    wo = wo_ref[0]                 # (H, D, E)
    bo = bo_ref[0]                 # (1, E)
    g1, be1 = g1_ref[0], be1_ref[0]
    w1, b1 = w1_ref[0], b1_ref[0]
    w2, b2 = w2_ref[0], b2_ref[0]
    g2, be2 = g2_ref[0], be2_ref[0]

    # TODO(synk): at production S / Nb, convert these static loops to lax.fori_loop to bound
    # code size; at these shapes each loop has 1-4 iterations.
    for n in range(Nb):                                   # static batch rows in this tile
        xn = out_ref[n]                                   # (S, E) f32, previous layer's output

        # Additive key mask, hoisted (once per layer per row).  torch masked_fill(-1e25)
        # saturates softmax either way; the bias must stay f32 added to f32 scores.
        neg = jnp.where(mask_ref[n] == 0, jnp.float32(-1e25), jnp.float32(0.0))[None]  # (1,1,S)

        # Head split (single rearrangement of x), then per-head-batched q/k/v projections.
        xh = jnp.swapaxes(xn.T.reshape(H, D, S), 1, 2).reshape(H * S, D)   # (H*S, D) f32
        xh = xh.astype(jnp.bfloat16)
        # wq already carries the 1/sqrt(embed_size) score scale (folded at init, free).
        q = jnp.dot(xh, wq, preferred_element_type=jnp.float32).astype(jnp.bfloat16)
        q = q.reshape(H, S, D)
        k = jnp.dot(xh, wk, preferred_element_type=jnp.float32).astype(jnp.bfloat16)
        k = k.reshape(H, S, D)
        v = jnp.dot(xh, wv, preferred_element_type=jnp.float32).astype(jnp.bfloat16)
        v = v.reshape(H, S, D)

        for qi in range(n_q):                             # static query-row tiles
            q0 = qi * block_q
            q_t = q[:, q0:q0 + block_q, :]                # (H, bq, D) bf16
            x_t = xn[q0:q0 + block_q, :]                  # (bq, E)   f32 residual input

            # --- online (flash-style) softmax over key tiles: no (H,S,S) materialization ---
            m_i = jnp.full((H, block_q, 1), -jnp.inf, jnp.float32)
            l_i = jnp.zeros((H, block_q, 1), jnp.float32)
            acc = jnp.zeros((H, block_q, D), jnp.float32)
            for ki in range(n_kv):                        # static key tiles
                k0 = ki * block_kv
                s = jnp.einsum("hqd,hkd->hqk", q_t, k[:, k0:k0 + block_kv, :],
                               preferred_element_type=jnp.float32)
                s = s + neg[:, :, k0:k0 + block_kv]       # (H, bq, bkv) f32
                m_new = jnp.maximum(m_i, jnp.max(s, axis=-1, keepdims=True))
                alpha = jnp.exp(m_i - m_new)
                p = jnp.exp(s - m_new)
                l_i = alpha * l_i + jnp.sum(p, axis=-1, keepdims=True)
                acc = alpha * acc + jnp.einsum("hqk,hkd->hqd", p.astype(jnp.bfloat16),
                                               v[:, k0:k0 + block_kv, :],
                                               preferred_element_type=jnp.float32)
                m_i = m_new
            # Fold the softmax normalization into the (small) context tile (EUP reciprocal).
            ctx = acc * pl.reciprocal(l_i, approx=True)   # (H, bq, D) f32

            # --- head merge as MXU accumulation against head-split wo (no XLU transpose) ---
            attn = jnp.zeros((block_q, E), jnp.float32)
            for h in range(H):                            # static, H small
                attn = attn + jnp.dot(ctx[h].astype(jnp.bfloat16), wo[h],
                                      preferred_element_type=jnp.float32)
            attn = attn + bo                              # fc_out bias

            # Dropout is identity (inference / p effectively 0).
            h1 = _layernorm(attn + x_t, g1, be1)          # norm1(attention + query)

            # --- FFN on the same row tile (caps the (rows, F) ReLU intermediate) ---
            ff = jnp.dot(h1.astype(jnp.bfloat16), w1, preferred_element_type=jnp.float32) + b1
            ff = jnp.maximum(ff, 0.0)
            ff = jnp.dot(ff.astype(jnp.bfloat16), w2, preferred_element_type=jnp.float32) + b2

            out_ref[n, q0:q0 + block_q, :] = _layernorm(ff + h1, g2, be2)   # norm2(forward + x)


def _pick_tile(total, target):
    t = max(1, min(target, total))
    while total % t:
        t -= 1
    return t


def _vmem_limit_bytes():
    # Default scoped VMEM is only 16 MiB (v5e) / 32 MiB (v6e/v7x); raise it explicitly,
    # leaving headroom for DMA metadata (v7x: 64 MiB physical, v5e/v6e: 128 MiB).
    try:
        cap = int(pltpu.get_tpu_info().vmem_capacity_bytes)
        return max(32 << 20, min(cap - (8 << 20), 100 << 20))
    except Exception:
        return 56 << 20


def encoder_layers(x, mask, layer_params, *, heads,
                   block_n=8, block_q=256, block_kv=512):
    """Runs all stacked transformer blocks in a single pallas_call."""
    N, S, E = x.shape
    assert E % heads == 0
    L = layer_params["wv"].shape[0]
    nb = _pick_tile(N, block_n)     # batch rows per grid step (cuts weight re-DMA by nb x)
    bq = _pick_tile(S, block_q)     # query-row tile (attention + fc_out + LN + FFN)
    bkv = _pick_tile(S, block_kv)   # key tile of the online softmax

    weight_names = ("wv", "wk", "wq", "wo", "bo", "g1", "be1",
                    "w1", "b1", "w2", "b2", "g2", "be2")
    weights = tuple(layer_params[name] for name in weight_names)

    def layer_spec(a):
        # One layer per grid step; constant in n, varies with l, so the pipeline prefetches
        # layer l+1's weights while layer l computes.
        return pl.BlockSpec((1,) + a.shape[1:],
                            lambda n, l, nd=a.ndim: (l,) + (0,) * (nd - 1))

    kernel = functools.partial(encoder_layers_kernel, heads=heads,
                               block_q=bq, block_kv=bkv)

    return pl.pallas_call(
        kernel,
        out_shape=jax.ShapeDtypeStruct((N, S, E), jnp.float32),
        grid_spec=pltpu.PrefetchScalarGridSpec(
            num_scalar_prefetch=0,
            grid=(N // nb, L),    # batch tiles parallel (megacore), layers = sequential carry
            in_specs=[pl.BlockSpec((nb, S, E), lambda n, l: (n, 0, 0)),
                      pl.BlockSpec((nb, 1, S), lambda n, l: (n, 0, 0))]
                     + [layer_spec(w) for w in weights],
            out_specs=pl.BlockSpec((nb, S, E), lambda n, l: (n, 0, 0)),
        ),
        compiler_params=pltpu.CompilerParams(
            dimension_semantics=("parallel", "arbitrary"),
            vmem_limit_bytes=_vmem_limit_bytes()),
    )(x, mask, *weights)


def init_encoder_params(key, *, vocab, max_len, embed_size, heads, n_layers,
                        forward_expansion):
    E = embed_size
    D = E // heads
    F = forward_expansion * E
    keys = jax.random.split(key, 2 + 8 * n_layers)

    emb = 0.02 * jax.random.normal(keys[0], (vocab, E), jnp.float32)
    pos = 0.02 * jax.random.normal(keys[1], (max_len, E), jnp.float32)

    inv_scale = 1.0 / float(E) ** 0.5     # torch divides scores by sqrt(embed_size)

    def make_layer(k):
        wv = 0.1 * jax.random.normal(k[0], (D, D), jnp.float32)   # torch Linear weight (out, in)
        wk = 0.1 * jax.random.normal(k[1], (D, D), jnp.float32)
        wq = 0.1 * jax.random.normal(k[2], (D, D), jnp.float32)
        wo = 0.1 * jax.random.normal(k[3], (E, E), jnp.float32)
        bo = 0.02 * jax.random.normal(k[4], (E,), jnp.float32)
        w1 = 0.1 * jax.random.normal(k[5], (F, E), jnp.float32)
        b1 = 0.02 * jax.random.normal(k[6], (F,), jnp.float32)
        w2 = 0.1 * jax.random.normal(k[7], (E, F), jnp.float32)
        b2 = jnp.zeros((E,), jnp.float32)
        return {
            # pre-transposed so the kernel does x @ W^T; matmul weights stored in bf16
            "wv": wv.T.astype(jnp.bfloat16),
            "wk": wk.T.astype(jnp.bfloat16),
            # 1/sqrt(embed_size) folded into wq offline (removes an in-kernel multiply)
            "wq": (wq.T * inv_scale).astype(jnp.bfloat16),
            # fc_out weight stored head-split (H, D, E): head merge is an MXU accumulation
            "wo": wo.T.reshape(heads, D, E).astype(jnp.bfloat16),
            "bo": bo.reshape(1, E),
            "g1": jnp.ones((1, E), jnp.float32),
            "be1": jnp.zeros((1, E), jnp.float32),
            "w1": w1.T.astype(jnp.bfloat16),    # (E, F)
            "b1": b1.reshape(1, F),
            "w2": w2.T.astype(jnp.bfloat16),    # (F, E)
            "b2": b2.reshape(1, E),
            "g2": jnp.ones((1, E), jnp.float32),
            "be2": jnp.zeros((1, E), jnp.float32),
        }

    layers = [make_layer(keys[2 + 8 * l: 2 + 8 * (l + 1)]) for l in range(n_layers)]
    stacked = {name: jnp.stack([lp[name] for lp in layers], axis=0) for name in layers[0]}
    return {"emb": emb, "pos": pos, "layers": stacked}


def encoder_forward(token_ids, mask, params, *, heads):
    N, S = token_ids.shape
    tok = jnp.take(params["emb"], token_ids, axis=0)        # (N, S, E) gather (plain-JAX glue)
    pos = params["pos"][:S]                                 # (S, E)
    x = tok + pos[None]
    # TODO(synk): Encoder/TransformerBlock dropout is identity (inference / p effectively 0).
    return encoder_layers(x, mask, params["layers"], heads=heads)


def encoder_reference(token_ids, mask, params, *, heads):
    """Pure-JAX f32 reference mirroring the torch Encoder forward (for validation).

    Note: the stored wq already carries the 1/sqrt(embed_size) score scaling and wo is stored
    head-split, so the reference uses them accordingly (semantics identical to the torch code).
    """
    N, S = token_ids.shape
    x = jnp.take(params["emb"], token_ids, axis=0) + params["pos"][:S][None]
    E = x.shape[-1]
    H = heads
    D = E // H
    L = params["layers"]["wv"].shape[0]
    for l in range(L):
        p = {name: arr[l].astype(jnp.float32) for name, arr in params["layers"].items()}
        xh = x.reshape(N, S, H, D)
        q = xh @ p["wq"]                     # wq already includes 1/sqrt(embed_size)
        k = xh @ p["wk"]
        v = xh @ p["wv"]
        scores = jnp.einsum("nqhd,nkhd->nhqk", q, k)
        scores = jnp.where(mask[:, :, None, :] == 0, -1e25, scores)
        attn = jax.nn.softmax(scores, axis=-1)
        ctx = jnp.einsum("nhqk,nkhd->nqhd", attn, v).reshape(N, S, E)
        attn_out = ctx @ p["wo"].reshape(E, E) + p["bo"][0]
        h1 = _layernorm(attn_out + x, p["g1"][0], p["be1"][0])
        ff = jnp.maximum(h1 @ p["w1"] + p["b1"][0], 0.0)
        ff = ff @ p["w2"] + p["b2"][0]
        x = _layernorm(ff + h1, p["g2"][0], p["be2"][0])
    return x


if __name__ == "__main__":
    N, S = 2, 8
    EMBED, HEADS, N_LAYERS, FWD_EXP = 32, 4, 2, 4
    VOCAB, MAX_LEN = 50, 16

    key = jax.random.PRNGKey(0)
    k_ids, k_params = jax.random.split(key)

    token_ids = jax.random.randint(k_ids, (N, S), 0, VOCAB, dtype=jnp.int32)
    # key-padding-style mask: batch 1 has its last two positions masked out
    mask = jnp.ones((N, 1, S), jnp.int32).at[1, 0, S - 2:].set(0)

    params = init_encoder_params(
        k_params, vocab=VOCAB, max_len=MAX_LEN, embed_size=EMBED,
        heads=HEADS, n_layers=N_LAYERS, forward_expansion=FWD_EXP)

    fwd = jax.jit(functools.partial(encoder_forward, heads=HEADS))
    out = jax.block_until_ready(fwd(token_ids, mask, params))

    assert out.shape == (N, S, EMBED) and out.dtype == jnp.float32
    assert bool(jnp.all(jnp.isfinite(out)))

    ref = encoder_reference(token_ids, mask, params, heads=HEADS)
    max_err = float(jnp.max(jnp.abs(out - ref)))
    assert max_err < 0.2, f"kernel deviates from reference: max_err={max_err}"

    print("KERNEL_OK")
</pallas_src>

<mosaic_0001>
module attributes {stable_mosaic.version = 11 : i64} {
  func.func @encoder_layers_kernel(%arg0: i32, %arg1: i32, %arg2: memref<2x8x32xf32, #tpu.memory_space<vmem>>, %arg3: memref<2x1x8xi32, #tpu.memory_space<vmem>>, %arg4: memref<1x8x8xbf16, #tpu.memory_space<vmem>>, %arg5: memref<1x8x8xbf16, #tpu.memory_space<vmem>>, %arg6: memref<1x8x8xbf16, #tpu.memory_space<vmem>>, %arg7: memref<1x4x8x32xbf16, #tpu.memory_space<vmem>>, %arg8: memref<1x1x32xf32, #tpu.memory_space<vmem>>, %arg9: memref<1x1x32xf32, #tpu.memory_space<vmem>>, %arg10: memref<1x1x32xf32, #tpu.memory_space<vmem>>, %arg11: memref<1x32x128xbf16, #tpu.memory_space<vmem>>, %arg12: memref<1x1x128xf32, #tpu.memory_space<vmem>>, %arg13: memref<1x128x32xbf16, #tpu.memory_space<vmem>>, %arg14: memref<1x1x32xf32, #tpu.memory_space<vmem>>, %arg15: memref<1x1x32xf32, #tpu.memory_space<vmem>>, %arg16: memref<1x1x32xf32, #tpu.memory_space<vmem>>, %arg17: memref<2x8x32xf32, #tpu.memory_space<vmem>>) attributes {dimension_semantics = [#tpu.dimension_semantics<parallel>, #tpu.dimension_semantics<arbitrary>], iteration_bounds = array<i64: 1, 2>, scalar_prefetch = 0 : i64, scratch_operands = 0 : i64, tpu.core_type = #tpu.core_type<tc>, window_params = [{transform_indices = @transform_0, window_bounds = array<i64: 2, 8, 32>}, {transform_indices = @transform_1, window_bounds = array<i64: 2, 1, 8>}, {transform_indices = @transform_2, window_bounds = array<i64: 1, 8, 8>}, {transform_indices = @transform_3, window_bounds = array<i64: 1, 8, 8>}, {transform_indices = @transform_4, window_bounds = array<i64: 1, 8, 8>}, {transform_indices = @transform_5, window_bounds = array<i64: 1, 4, 8, 32>}, {transform_indices = @transform_6, window_bounds = array<i64: 1, 1, 32>}, {transform_indices = @transform_7, window_bounds = array<i64: 1, 1, 32>}, {transform_indices = @transform_8, window_bounds = array<i64: 1, 1, 32>}, {transform_indices = @transform_9, window_bounds = array<i64: 1, 32, 128>}, {transform_indices = @transform_10, window_bounds = array<i64: 1, 1, 128>}, {transform_indices = @transform_11, window_bounds = array<i64: 1, 128, 32>}, {transform_indices = @transform_12, window_bounds = array<i64: 1, 1, 32>}, {transform_indices = @transform_13, window_bounds = array<i64: 1, 1, 32>}, {transform_indices = @transform_14, window_bounds = array<i64: 1, 1, 32>}, {transform_indices = @transform_15, window_bounds = array<i64: 2, 8, 32>}]} {
    %c0_i32 = arith.constant 0 : i32
    %0 = arith.cmpi eq, %arg1, %c0_i32 : i32
    %1 = arith.extui %0 : i1 to i32
    %c0_i32_0 = arith.constant 0 : i32
    %2 = arith.cmpi ne, %1, %c0_i32_0 : i32
    scf.if %2 {
      %c0_118 = arith.constant 0 : index
      %c0_119 = arith.constant 0 : index
      %c0_120 = arith.constant 0 : index
      %309 = vector.load %arg2[%c0_118, %c0_119, %c0_120] : memref<2x8x32xf32, #tpu.memory_space<vmem>>, vector<2x8x32xf32>
      %c0_121 = arith.constant 0 : index
      %c0_122 = arith.constant 0 : index
      %c0_123 = arith.constant 0 : index
      %310 = vector.load %arg17[%c0_121, %c0_122, %c0_123] : memref<2x8x32xf32, #tpu.memory_space<vmem>>, vector<2x8x32xf32>
      tpu.vector_store %arg17[%c0_121, %c0_122, %c0_123], %309 {strides = array<i32>} : memref<2x8x32xf32, #tpu.memory_space<vmem>>, vector<2x8x32xf32>,
    } else {
    }
    %c0 = arith.constant 0 : index
    %c0_1 = arith.constant 0 : index
    %c0_2 = arith.constant 0 : index
    %3 = vector.load %arg6[%c0, %c0_1, %c0_2] : memref<1x8x8xbf16, #tpu.memory_space<vmem>>, vector<1x8x8xbf16>
    %4 = vector.shape_cast %3 : vector<1x8x8xbf16> to vector<8x8xbf16>
    %c0_3 = arith.constant 0 : index
    %c0_4 = arith.constant 0 : index
    %c0_5 = arith.constant 0 : index
    %5 = vector.load %arg5[%c0_3, %c0_4, %c0_5] : memref<1x8x8xbf16, #tpu.memory_space<vmem>>, vector<1x8x8xbf16>
    %6 = vector.shape_cast %5 : vector<1x8x8xbf16> to vector<8x8xbf16>
    %c0_6 = arith.constant 0 : index
    %c0_7 = arith.constant 0 : index
    %c0_8 = arith.constant 0 : index
    %7 = vector.load %arg4[%c0_6, %c0_7, %c0_8] : memref<1x8x8xbf16, #tpu.memory_space<vmem>>, vector<1x8x8xbf16>
    %8 = vector.shape_cast %7 : vector<1x8x8xbf16> to vector<8x8xbf16>
    %c0_9 = arith.constant 0 : index
    %c0_10 = arith.constant 0 : index
    %c0_11 = arith.constant 0 : index
    %c0_12 = arith.constant 0 : index
    %9 = vector.load %arg7[%c0_9, %c0_10, %c0_11, %c0_12] : memref<1x4x8x32xbf16, #tpu.memory_space<vmem>>, vector<1x4x8x32xbf16>
    %10 = vector.shape_cast %9 : vector<1x4x8x32xbf16> to vector<4x8x32xbf16>
    %c0_13 = arith.constant 0 : index
    %c0_14 = arith.constant 0 : index
    %c0_15 = arith.constant 0 : index
    %11 = vector.load %arg8[%c0_13, %c0_14, %c0_15] : memref<1x1x32xf32, #tpu.memory_space<vmem>>, vector<1x1x32xf32>
    %12 = vector.shape_cast %11 : vector<1x1x32xf32> to vector<1x32xf32>
    %c0_16 = arith.constant 0 : index
    %c0_17 = arith.constant 0 : index
    %c0_18 = arith.constant 0 : index
    %13 = vector.load %arg9[%c0_16, %c0_17, %c0_18] : memref<1x1x32xf32, #tpu.memory_space<vmem>>, vector<1x1x32xf32>
    %14 = vector.shape_cast %13 : vector<1x1x32xf32> to vector<1x32xf32>
    %c0_19 = arith.constant 0 : index
    %c0_20 = arith.constant 0 : index
    %c0_21 = arith.constant 0 : index
    %15 = vector.load %arg10[%c0_19, %c0_20, %c0_21] : memref<1x1x32xf32, #tpu.memory_space<vmem>>, vector<1x1x32xf32>
    %16 = vector.shape_cast %15 : vector<1x1x32xf32> to vector<1x32xf32>
    %c0_22 = arith.constant 0 : index
    %c0_23 = arith.constant 0 : index
    %c0_24 = arith.constant 0 : index
    %17 = vector.load %arg11[%c0_22, %c0_23, %c0_24] : memref<1x32x128xbf16, #tpu.memory_space<vmem>>, vector<1x32x128xbf16>
    %18 = vector.shape_cast %17 : vector<1x32x128xbf16> to vector<32x128xbf16>
    %c0_25 = arith.constant 0 : index
    %c0_26 = arith.constant 0 : index
    %c0_27 = arith.constant 0 : index
    %19 = vector.load %arg12[%c0_25, %c0_26, %c0_27] : memref<1x1x128xf32, #tpu.memory_space<vmem>>, vector<1x1x128xf32>
    %20 = vector.shape_cast %19 : vector<1x1x128xf32> to vector<1x128xf32>
    %c0_28 = arith.constant 0 : index
    %c0_29 = arith.constant 0 : index
    %c0_30 = arith.constant 0 : index
    %21 = vector.load %arg13[%c0_28, %c0_29, %c0_30] : memref<1x128x32xbf16, #tpu.memory_space<vmem>>, vector<1x128x32xbf16>
    %22 = vector.shape_cast %21 : vector<1x128x32xbf16> to vector<128x32xbf16>
    %c0_31 = arith.constant 0 : index
    %c0_32 = arith.constant 0 : index
    %c0_33 = arith.constant 0 : index
    %23 = vector.load %arg14[%c0_31, %c0_32, %c0_33] : memref<1x1x32xf32, #tpu.memory_space<vmem>>, vector<1x1x32xf32>
    %24 = vector.shape_cast %23 : vector<1x1x32xf32> to vector<1x32xf32>
    %c0_34 = arith.constant 0 : index
    %c0_35 = arith.constant 0 : index
    %c0_36 = arith.constant 0 : index
    %25 = vector.load %arg15[%c0_34, %c0_35, %c0_36] : memref<1x1x32xf32, #tpu.memory_space<vmem>>, vector<1x1x32xf32>
    %26 = vector.shape_cast %25 : vector<1x1x32xf32> to vector<1x32xf32>
    %c0_37 = arith.constant 0 : index
    %c0_38 = arith.constant 0 : index
    %c0_39 = arith.constant 0 : index
    %27 = vector.load %arg16[%c0_37, %c0_38, %c0_39] : memref<1x1x32xf32, #tpu.memory_space<vmem>>, vector<1x1x32xf32>
    %28 = vector.shape_cast %27 : vector<1x1x32xf32> to vector<1x32xf32>
    %c0_40 = arith.constant 0 : index
    %c0_41 = arith.constant 0 : index
    %c0_42 = arith.constant 0 : index
    %29 = vector.load %arg17[%c0_40, %c0_41, %c0_42] : memref<2x8x32xf32, #tpu.memory_space<vmem>>, vector<1x8x32xf32>
    %30 = vector.shape_cast %29 : vector<1x8x32xf32> to vector<8x32xf32>
    %c0_43 = arith.constant 0 : index
    %c0_44 = arith.constant 0 : index
    %c0_45 = arith.constant 0 : index
    %31 = vector.load %arg3[%c0_43, %c0_44, %c0_45] : memref<2x1x8xi32, #tpu.memory_space<vmem>>, vector<1x1x8xi32>
    %32 = vector.shape_cast %31 : vector<1x1x8xi32> to vector<1x8xi32>
    %c0_i32_46 = arith.constant 0 : i32
    %33 = vector.broadcast %c0_i32_46 : i32 to vector<1x8xi32>
    %34 = arith.cmpi eq, %32, %33 : vector<1x8xi32>
    %cst = arith.constant -9.99999956E+24 : f32
    %cst_47 = arith.constant 0.000000e+00 : f32
    %35 = vector.broadcast %cst : f32 to vector<1x8xf32>
    %36 = vector.broadcast %cst_47 : f32 to vector<1x8xf32>
    %37 = arith.select %34, %35, %36 : vector<1x8xi1>, vector<1x8xf32>
    %38 = vector.shape_cast %37 : vector<1x8xf32> to vector<1x1x8xf32>
    %39 = tpu.transpose %30, [1, 0] : vector<8x32xf32> -> vector<32x8xf32>
    %40 = vector.shape_cast %39 : vector<32x8xf32> to vector<4x8x8xf32>
    %41 = tpu.transpose %40, [0, 2, 1] : vector<4x8x8xf32> -> vector<4x8x8xf32>
    %42 = vector.shape_cast %41 : vector<4x8x8xf32> to vector<32x8xf32>
    %43 = arith.truncf %42 : vector<32x8xf32> to vector<32x8xbf16>
    %cst_48 = arith.constant dense<0.000000e+00> : vector<32x8xf32>
    %44 = tpu.matmul %43, %4, %cst_48 {dimension_numbers = #tpu.dot_dimension_numbers<[1], [0], [0], [1], [0, 0, 1, 1], [], []>} : vector<32x8xbf16>, vector<8x8xbf16>, vector<32x8xf32> -> vector<32x8xf32>
    %45 = arith.truncf %44 : vector<32x8xf32> to vector<32x8xbf16>
    %46 = vector.shape_cast %45 : vector<32x8xbf16> to vector<4x8x8xbf16>
    %cst_49 = arith.constant dense<0.000000e+00> : vector<32x8xf32>
    %47 = tpu.matmul %43, %6, %cst_49 {dimension_numbers = #tpu.dot_dimension_numbers<[1], [0], [0], [1], [0, 0, 1, 1], [], []>} : vector<32x8xbf16>, vector<8x8xbf16>, vector<32x8xf32> -> vector<32x8xf32>
    %48 = arith.truncf %47 : vector<32x8xf32> to vector<32x8xbf16>
    %49 = vector.shape_cast %48 : vector<32x8xbf16> to vector<4x8x8xbf16>
    %cst_50 = arith.constant dense<0.000000e+00> : vector<32x8xf32>
    %50 = tpu.matmul %43, %8, %cst_50 {dimension_numbers = #tpu.dot_dimension_numbers<[1], [0], [0], [1], [0, 0, 1, 1], [], []>} : vector<32x8xbf16>, vector<8x8xbf16>, vector<32x8xf32> -> vector<32x8xf32>
    %51 = arith.truncf %50 : vector<32x8xf32> to vector<32x8xbf16>
    %52 = vector.shape_cast %51 : vector<32x8xbf16> to vector<4x8x8xbf16>
    %cst_51 = arith.constant 0xFF800000 : f32
    %53 = vector.broadcast %cst_51 : f32 to vector<4x8x1xf32>
    %cst_52 = arith.constant 0.000000e+00 : f32
    %54 = vector.broadcast %cst_52 : f32 to vector<4x8x1xf32>
    %cst_53 = arith.constant 0.000000e+00 : f32
    %55 = vector.broadcast %cst_53 : f32 to vector<4x8x8xf32>
    "tpu.trace_start"() <{level = 10 : i32, message = "hqd,hkd->hqk"}> : () -> ()
    %cst_54 = arith.constant dense<0.000000e+00> : vector<4x8x8xf32>
    %56 = tpu.matmul %46, %49, %cst_54 {dimension_numbers = #tpu.dot_dimension_numbers<[2], [2], [1], [1], [0, 0, 0, 1, 1, 1], [0], [0]>} : vector<4x8x8xbf16>, vector<4x8x8xbf16>, vector<4x8x8xf32> -> vector<4x8x8xf32>
    "tpu.trace_stop"() : () -> ()
    %57 = vector.broadcast %38 : vector<1x1x8xf32> to vector<4x8x8xf32>
    %58 = arith.addf %56, %57 : vector<4x8x8xf32>
    %cst_55 = arith.constant dense<0xFF800000> : vector<4x8xf32>
    %59 = vector.multi_reduction <maximumf>, %58, %cst_55 [2] : vector<4x8x8xf32> to vector<4x8xf32>
    %60 = vector.shape_cast %59 : vector<4x8xf32> to vector<4x8x1xf32>
    %61 = arith.maximumf %53, %60 : vector<4x8x1xf32>
    %62 = arith.subf %53, %61 : vector<4x8x1xf32>
    %63 = math.exp %62 : vector<4x8x1xf32>
    %64 = vector.broadcast %61 : vector<4x8x1xf32> to vector<4x8x8xf32>
    %65 = arith.subf %58, %64 : vector<4x8x8xf32>
    %66 = math.exp %65 : vector<4x8x8xf32>
    %67 = arith.mulf %63, %54 : vector<4x8x1xf32>
    %cst_56 = arith.constant dense<0.000000e+00> : vector<4x8xf32>
    %68 = vector.multi_reduction <add>, %66, %cst_56 [2] : vector<4x8x8xf32> to vector<4x8xf32>
    %69 = vector.shape_cast %68 : vector<4x8xf32> to vector<4x8x1xf32>
    %70 = arith.addf %67, %69 : vector<4x8x1xf32>
    %71 = vector.broadcast %63 : vector<4x8x1xf32> to vector<4x8x8xf32>
    %72 = arith.mulf %71, %55 : vector<4x8x8xf32>
    %73 = arith.truncf %66 : vector<4x8x8xf32> to vector<4x8x8xbf16>
    "tpu.trace_start"() <{level = 10 : i32, message = "hqk,hkd->hqd"}> : () -> ()
    %cst_57 = arith.constant dense<0.000000e+00> : vector<4x8x8xf32>
    %74 = tpu.matmul %73, %52, %cst_57 {dimension_numbers = #tpu.dot_dimension_numbers<[2], [1], [1], [2], [0, 0, 0, 1, 1, 2], [0], [0]>} : vector<4x8x8xbf16>, vector<4x8x8xbf16>, vector<4x8x8xf32> -> vector<4x8x8xf32>
    "tpu.trace_stop"() : () -> ()
    %75 = arith.addf %72, %74 : vector<4x8x8xf32>
    %76 = tpu.reciprocal %70 {approx = true} : vector<4x8x1xf32> -> vector<4x8x1xf32>
    %77 = vector.broadcast %76 : vector<4x8x1xf32> to vector<4x8x8xf32>
    %78 = arith.mulf %75, %77 : vector<4x8x8xf32>
    %cst_58 = arith.constant 0.000000e+00 : f32
    %79 = vector.broadcast %cst_58 : f32 to vector<8x32xf32>
    %80 = vector.extract_strided_slice %78 {offsets = [0, 0, 0], sizes = [1, 8, 8], strides = [1, 1, 1]} : vector<4x8x8xf32> to vector<1x8x8xf32>
    %81 = vector.shape_cast %80 : vector<1x8x8xf32> to vector<8x8xf32>
    %82 = arith.truncf %81 : vector<8x8xf32> to vector<8x8xbf16>
    %83 = vector.extract_strided_slice %10 {offsets = [0, 0, 0], sizes = [1, 8, 32], strides = [1, 1, 1]} : vector<4x8x32xbf16> to vector<1x8x32xbf16>
    %84 = vector.shape_cast %83 : vector<1x8x32xbf16> to vector<8x32xbf16>
    %cst_59 = arith.constant dense<0.000000e+00> : vector<8x32xf32>
    %85 = tpu.matmul %82, %84, %cst_59 {dimension_numbers = #tpu.dot_dimension_numbers<[1], [0], [0], [1], [0, 0, 1, 1], [], []>} : vector<8x8xbf16>, vector<8x32xbf16>, vector<8x32xf32> -> vector<8x32xf32>
    %86 = arith.addf %79, %85 : vector<8x32xf32>
    %87 = vector.extract_strided_slice %78 {offsets = [1, 0, 0], sizes = [1, 8, 8], strides = [1, 1, 1]} : vector<4x8x8xf32> to vector<1x8x8xf32>
    %88 = vector.shape_cast %87 : vector<1x8x8xf32> to vector<8x8xf32>
    %89 = arith.truncf %88 : vector<8x8xf32> to vector<8x8xbf16>
    %90 = vector.extract_strided_slice %10 {offsets = [1, 0, 0], sizes = [1, 8, 32], strides = [1, 1, 1]} : vector<4x8x32xbf16> to vector<1x8x32xbf16>
    %91 = vector.shape_cast %90 : vector<1x8x32xbf16> to vector<8x32xbf16>
    %cst_60 = arith.constant dense<0.000000e+00> : vector<8x32xf32>
    %92 = tpu.matmul %89, %91, %cst_60 {dimension_numbers = #tpu.dot_dimension_numbers<[1], [0], [0], [1], [0, 0, 1, 1], [], []>} : vector<8x8xbf16>, vector<8x32xbf16>, vector<8x32xf32> -> vector<8x32xf32>
    %93 = arith.addf %86, %92 : vector<8x32xf32>
    %94 = vector.extract_strided_slice %78 {offsets = [2, 0, 0], sizes = [1, 8, 8], strides = [1, 1, 1]} : vector<4x8x8xf32> to vector<1x8x8xf32>
    %95 = vector.shape_cast %94 : vector<1x8x8xf32> to vector<8x8xf32>
    %96 = arith.truncf %95 : vector<8x8xf32> to vector<8x8xbf16>
    %97 = vector.extract_strided_slice %10 {offsets = [2, 0, 0], sizes = [1, 8, 32], strides = [1, 1, 1]} : vector<4x8x32xbf16> to vector<1x8x32xbf16>
    %98 = vector.shape_cast %97 : vector<1x8x32xbf16> to vector<8x32xbf16>
    %cst_61 = arith.constant dense<0.000000e+00> : vector<8x32xf32>
    %99 = tpu.matmul %96, %98, %cst_61 {dimension_numbers = #tpu.dot_dimension_numbers<[1], [0], [0], [1], [0, 0, 1, 1], [], []>} : vector<8x8xbf16>, vector<8x32xbf16>, vector<8x32xf32> -> vector<8x32xf32>
    %100 = arith.addf %93, %99 : vector<8x32xf32>
    %101 = vector.extract_strided_slice %78 {offsets = [3, 0, 0], sizes = [1, 8, 8], strides = [1, 1, 1]} : vector<4x8x8xf32> to vector<1x8x8xf32>
    %102 = vector.shape_cast %101 : vector<1x8x8xf32> to vector<8x8xf32>
    %103 = arith.truncf %102 : vector<8x8xf32> to vector<8x8xbf16>
    %104 = vector.extract_strided_slice %10 {offsets = [3, 0, 0], sizes = [1, 8, 32], strides = [1, 1, 1]} : vector<4x8x32xbf16> to vector<1x8x32xbf16>
    %105 = vector.shape_cast %104 : vector<1x8x32xbf16> to vector<8x32xbf16>
    %cst_62 = arith.constant dense<0.000000e+00> : vector<8x32xf32>
    %106 = tpu.matmul %103, %105, %cst_62 {dimension_numbers = #tpu.dot_dimension_numbers<[1], [0], [0], [1], [0, 0, 1, 1], [], []>} : vector<8x8xbf16>, vector<8x32xbf16>, vector<8x32xf32> -> vector<8x32xf32>
    %107 = arith.addf %100, %106 : vector<8x32xf32>
    %108 = vector.broadcast %12 : vector<1x32xf32> to vector<8x32xf32>
    %109 = arith.addf %107, %108 : vector<8x32xf32>
    %110 = arith.addf %109, %30 : vector<8x32xf32>
    %cst_63 = arith.constant dense<0.000000e+00> : vector<8xf32>
    %111 = vector.multi_reduction <add>, %110, %cst_63 [1] : vector<8x32xf32> to vector<8xf32>
    %112 = vector.shape_cast %111 : vector<8xf32> to vector<8x1xf32>
    %cst_64 = arith.constant 3.200000e+01 : f32
    %113 = vector.broadcast %cst_64 : f32 to vector<8x1xf32>
    %114 = arith.divf %112, %113 : vector<8x1xf32>
    %115 = vector.broadcast %114 : vector<8x1xf32> to vector<8x32xf32>
    %116 = arith.subf %110, %115 : vector<8x32xf32>
    %117 = arith.mulf %116, %116 : vector<8x32xf32>
    %cst_65 = arith.constant dense<0.000000e+00> : vector<8xf32>
    %118 = vector.multi_reduction <add>, %117, %cst_65 [1] : vector<8x32xf32> to vector<8xf32>
    %119 = vector.shape_cast %118 : vector<8xf32> to vector<8x1xf32>
    %cst_66 = arith.constant 3.200000e+01 : f32
    %120 = vector.broadcast %cst_66 : f32 to vector<8x1xf32>
    %121 = arith.divf %119, %120 : vector<8x1xf32>
    %122 = vector.broadcast %114 : vector<8x1xf32> to vector<8x32xf32>
    %123 = arith.subf %110, %122 : vector<8x32xf32>
    %cst_67 = arith.constant 9.99999974E-6 : f32
    %124 = vector.broadcast %cst_67 : f32 to vector<8x1xf32>
    %125 = arith.addf %121, %124 : vector<8x1xf32>
    %126 = math.rsqrt %125 : vector<8x1xf32>
    %127 = vector.broadcast %126 : vector<8x1xf32> to vector<8x32xf32>
    %128 = arith.mulf %123, %127 : vector<8x32xf32>
    %129 = vector.broadcast %14 : vector<1x32xf32> to vector<8x32xf32>
    %130 = arith.mulf %128, %129 : vector<8x32xf32>
    %131 = vector.broadcast %16 : vector<1x32xf32> to vector<8x32xf32>
    %132 = arith.addf %130, %131 : vector<8x32xf32>
    %133 = arith.truncf %132 : vector<8x32xf32> to vector<8x32xbf16>
    %cst_68 = arith.constant dense<0.000000e+00> : vector<8x128xf32>
    %134 = tpu.matmul %133, %18, %cst_68 {dimension_numbers = #tpu.dot_dimension_numbers<[1], [0], [0], [1], [0, 0, 1, 1], [], []>} : vector<8x32xbf16>, vector<32x128xbf16>, vector<8x128xf32> -> vector<8x128xf32>
    %135 = vector.broadcast %20 : vector<1x128xf32> to vector<8x128xf32>
    %136 = arith.addf %134, %135 : vector<8x128xf32>
    %cst_69 = arith.constant 0.000000e+00 : f32
    %137 = vector.broadcast %cst_69 : f32 to vector<8x128xf32>
    %138 = arith.maximumf %136, %137 : vector<8x128xf32>
    %139 = arith.truncf %138 : vector<8x128xf32> to vector<8x128xbf16>
    %cst_70 = arith.constant dense<0.000000e+00> : vector<8x32xf32>
    %140 = tpu.matmul %139, %22, %cst_70 {dimension_numbers = #tpu.dot_dimension_numbers<[1], [0], [0], [1], [0, 0, 1, 1], [], []>} : vector<8x128xbf16>, vector<128x32xbf16>, vector<8x32xf32> -> vector<8x32xf32>
    %141 = vector.broadcast %24 : vector<1x32xf32> to vector<8x32xf32>
    %142 = arith.addf %140, %141 : vector<8x32xf32>
    %143 = arith.addf %142, %132 : vector<8x32xf32>
    %cst_71 = arith.constant dense<0.000000e+00> : vector<8xf32>
    %144 = vector.multi_reduction <add>, %143, %cst_71 [1] : vector<8x32xf32> to vector<8xf32>
    %145 = vector.shape_cast %144 : vector<8xf32> to vector<8x1xf32>
    %cst_72 = arith.constant 3.200000e+01 : f32
    %146 = vector.broadcast %cst_72 : f32 to vector<8x1xf32>
    %147 = arith.divf %145, %146 : vector<8x1xf32>
    %148 = vector.broadcast %147 : vector<8x1xf32> to vector<8x32xf32>
    %149 = arith.subf %143, %148 : vector<8x32xf32>
    %150 = arith.mulf %149, %149 : vector<8x32xf32>
    %cst_73 = arith.constant dense<0.000000e+00> : vector<8xf32>
    %151 = vector.multi_reduction <add>, %150, %cst_73 [1] : vector<8x32xf32> to vector<8xf32>
    %152 = vector.shape_cast %151 : vector<8xf32> to vector<8x1xf32>
    %cst_74 = arith.constant 3.200000e+01 : f32
    %153 = vector.broadcast %cst_74 : f32 to vector<8x1xf32>
    %154 = arith.divf %152, %153 : vector<8x1xf32>
    %155 = vector.broadcast %147 : vector<8x1xf32> to vector<8x32xf32>
    %156 = arith.subf %143, %155 : vector<8x32xf32>
    %cst_75 = arith.constant 9.99999974E-6 : f32
    %157 = vector.broadcast %cst_75 : f32 to vector<8x1xf32>
    %158 = arith.addf %154, %157 : vector<8x1xf32>
    %159 = math.rsqrt %158 : vector<8x1xf32>
    %160 = vector.broadcast %159 : vector<8x1xf32> to vector<8x32xf32>
    %161 = arith.mulf %156, %160 : vector<8x32xf32>
    %162 = vector.broadcast %26 : vector<1x32xf32> to vector<8x32xf32>
    %163 = arith.mulf %161, %162 : vector<8x32xf32>
    %164 = vector.broadcast %28 : vector<1x32xf32> to vector<8x32xf32>
    %165 = arith.addf %163, %164 : vector<8x32xf32>
    %c0_76 = arith.constant 0 : index
    %c0_77 = arith.constant 0 : index
    %c0_78 = arith.constant 0 : index
    %166 = vector.load %arg17[%c0_76, %c0_77, %c0_78] : memref<2x8x32xf32, #tpu.memory_space<vmem>>, vector<1x8x32xf32>
    %167 = vector.shape_cast %166 : vector<1x8x32xf32> to vector<8x32xf32>
    %168 = vector.shape_cast %165 : vector<8x32xf32> to vector<1x8x32xf32>
    tpu.vector_store %arg17[%c0_76, %c0_77, %c0_78], %168 {strides = array<i32>} : memref<2x8x32xf32, #tpu.memory_space<vmem>>, vector<1x8x32xf32>,
    %c1 = arith.constant 1 : index
    %c0_79 = arith.constant 0 : index
    %c0_80 = arith.constant 0 : index
    %169 = vector.load %arg17[%c1, %c0_79, %c0_80] : memref<2x8x32xf32, #tpu.memory_space<vmem>>, vector<1x8x32xf32>
    %170 = vector.shape_cast %169 : vector<1x8x32xf32> to vector<8x32xf32>
    %c1_81 = arith.constant 1 : index
    %c0_82 = arith.constant 0 : index
    %c0_83 = arith.constant 0 : index
    %171 = vector.load %arg3[%c1_81, %c0_82, %c0_83] : memref<2x1x8xi32, #tpu.memory_space<vmem>>, vector<1x1x8xi32>
    %172 = vector.shape_cast %171 : vector<1x1x8xi32> to vector<1x8xi32>
    %c0_i32_84 = arith.constant 0 : i32
    %173 = vector.broadcast %c0_i32_84 : i32 to vector<1x8xi32>
    %174 = arith.cmpi eq, %172, %173 : vector<1x8xi32>
    %cst_85 = arith.constant -9.99999956E+24 : f32
    %cst_86 = arith.constant 0.000000e+00 : f32
    %175 = vector.broadcast %cst_85 : f32 to vector<1x8xf32>
    %176 = vector.broadcast %cst_86 : f32 to vector<1x8xf32>
    %177 = arith.select %174, %175, %176 : vector<1x8xi1>, vector<1x8xf32>
    %178 = vector.shape_cast %177 : vector<1x8xf32> to vector<1x1x8xf32>
    %179 = tpu.transpose %170, [1, 0] : vector<8x32xf32> -> vector<32x8xf32>
    %180 = vector.shape_cast %179 : vector<32x8xf32> to vector<4x8x8xf32>
    %181 = tpu.transpose %180, [0, 2, 1] : vector<4x8x8xf32> -> vector<4x8x8xf32>
    %182 = vector.shape_cast %181 : vector<4x8x8xf32> to vector<32x8xf32>
    %183 = arith.truncf %182 : vector<32x8xf32> to vector<32x8xbf16>
    %cst_87 = arith.constant dense<0.000000e+00> : vector<32x8xf32>
    %184 = tpu.matmul %183, %4, %cst_87 {dimension_numbers = #tpu.dot_dimension_numbers<[1], [0], [0], [1], [0, 0, 1, 1], [], []>} : vector<32x8xbf16>, vector<8x8xbf16>, vector<32x8xf32> -> vector<32x8xf32>
    %185 = arith.truncf %184 : vector<32x8xf32> to vector<32x8xbf16>
    %186 = vector.shape_cast %185 : vector<32x8xbf16> to vector<4x8x8xbf16>
    %cst_88 = arith.constant dense<0.000000e+00> : vector<32x8xf32>
    %187 = tpu.matmul %183, %6, %cst_88 {dimension_numbers = #tpu.dot_dimension_numbers<[1], [0], [0], [1], [0, 0, 1, 1], [], []>} : vector<32x8xbf16>, vector<8x8xbf16>, vector<32x8xf32> -> vector<32x8xf32>
    %188 = arith.truncf %187 : vector<32x8xf32> to vector<32x8xbf16>
    %189 = vector.shape_cast %188 : vector<32x8xbf16> to vector<4x8x8xbf16>
    %cst_89 = arith.constant dense<0.000000e+00> : vector<32x8xf32>
    %190 = tpu.matmul %183, %8, %cst_89 {dimension_numbers = #tpu.dot_dimension_numbers<[1], [0], [0], [1], [0, 0, 1, 1], [], []>} : vector<32x8xbf16>, vector<8x8xbf16>, vector<32x8xf32> -> vector<32x8xf32>
    %191 = arith.truncf %190 : vector<32x8xf32> to vector<32x8xbf16>
    %192 = vector.shape_cast %191 : vector<32x8xbf16> to vector<4x8x8xbf16>
    %cst_90 = arith.constant 0xFF800000 : f32
    %193 = vector.broadcast %cst_90 : f32 to vector<4x8x1xf32>
    %cst_91 = arith.constant 0.000000e+00 : f32
    %194 = vector.broadcast %cst_91 : f32 to vector<4x8x1xf32>
    %cst_92 = arith.constant 0.000000e+00 : f32
    %195 = vector.broadcast %cst_92 : f32 to vector<4x8x8xf32>
    "tpu.trace_start"() <{level = 10 : i32, message = "hqd,hkd->hqk"}> : () -> ()
    %cst_93 = arith.constant dense<0.000000e+00> : vector<4x8x8xf32>
    %196 = tpu.matmul %186, %189, %cst_93 {dimension_numbers = #tpu.dot_dimension_numbers<[2], [2], [1], [1], [0, 0, 0, 1, 1, 1], [0], [0]>} : vector<4x8x8xbf16>, vector<4x8x8xbf16>, vector<4x8x8xf32> -> vector<4x8x8xf32>
    "tpu.trace_stop"() : () -> ()
    %197 = vector.broadcast %178 : vector<1x1x8xf32> to vector<4x8x8xf32>
    %198 = arith.addf %196, %197 : vector<4x8x8xf32>
    %cst_94 = arith.constant dense<0xFF800000> : vector<4x8xf32>
    %199 = vector.multi_reduction <maximumf>, %198, %cst_94 [2] : vector<4x8x8xf32> to vector<4x8xf32>
    %200 = vector.shape_cast %199 : vector<4x8xf32> to vector<4x8x1xf32>
    %201 = arith.maximumf %193, %200 : vector<4x8x1xf32>
    %202 = arith.subf %193, %201 : vector<4x8x1xf32>
    %203 = math.exp %202 : vector<4x8x1xf32>
    %204 = vector.broadcast %201 : vector<4x8x1xf32> to vector<4x8x8xf32>
    %205 = arith.subf %198, %204 : vector<4x8x8xf32>
    %206 = math.exp %205 : vector<4x8x8xf32>
    %207 = arith.mulf %203, %194 : vector<4x8x1xf32>
    %cst_95 = arith.constant dense<0.000000e+00> : vector<4x8xf32>
    %208 = vector.multi_reduction <add>, %206, %cst_95 [2] : vector<4x8x8xf32> to vector<4x8xf32>
    %209 = vector.shape_cast %208 : vector<4x8xf32> to vector<4x8x1xf32>
    %210 = arith.addf %207, %209 : vector<4x8x1xf32>
    %211 = vector.broadcast %203 : vector<4x8x1xf32> to vector<4x8x8xf32>
    %212 = arith.mulf %211, %195 : vector<4x8x8xf32>
    %213 = arith.truncf %206 : vector<4x8x8xf32> to vector<4x8x8xbf16>
    "tpu.trace_start"() <{level = 10 : i32, message = "hqk,hkd->hqd"}> : () -> ()
    %cst_96 = arith.constant dense<0.000000e+00> : vector<4x8x8xf32>
    %214 = tpu.matmul %213, %192, %cst_96 {dimension_numbers = #tpu.dot_dimension_numbers<[2], [1], [1], [2], [0, 0, 0, 1, 1, 2], [0], [0]>} : vector<4x8x8xbf16>, vector<4x8x8xbf16>, vector<4x8x8xf32> -> vector<4x8x8xf32>
    "tpu.trace_stop"() : () -> ()
    %215 = arith.addf %212, %214 : vector<4x8x8xf32>
    %216 = tpu.reciprocal %210 {approx = true} : vector<4x8x1xf32> -> vector<4x8x1xf32>
    %217 = vector.broadcast %216 : vector<4x8x1xf32> to vector<4x8x8xf32>
    %218 = arith.mulf %215, %217 : vector<4x8x8xf32>
    %cst_97 = arith.constant 0.000000e+00 : f32
    %219 = vector.broadcast %cst_97 : f32 to vector<8x32xf32>
    %220 = vector.extract_strided_slice %218 {offsets = [0, 0, 0], sizes = [1, 8, 8], strides = [1, 1, 1]} : vector<4x8x8xf32> to vector<1x8x8xf32>
    %221 = vector.shape_cast %220 : vector<1x8x8xf32> to vector<8x8xf32>
    %222 = arith.truncf %221 : vector<8x8xf32> to vector<8x8xbf16>
    %223 = vector.extract_strided_slice %10 {offsets = [0, 0, 0], sizes = [1, 8, 32], strides = [1, 1, 1]} : vector<4x8x32xbf16> to vector<1x8x32xbf16>
    %224 = vector.shape_cast %223 : vector<1x8x32xbf16> to vector<8x32xbf16>
    %cst_98 = arith.constant dense<0.000000e+00> : vector<8x32xf32>
    %225 = tpu.matmul %222, %224, %cst_98 {dimension_numbers = #tpu.dot_dimension_numbers<[1], [0], [0], [1], [0, 0, 1, 1], [], []>} : vector<8x8xbf16>, vector<8x32xbf16>, vector<8x32xf32> -> vector<8x32xf32>
    %226 = arith.addf %219, %225 : vector<8x32xf32>
    %227 = vector.extract_strided_slice %218 {offsets = [1, 0, 0], sizes = [1, 8, 8], strides = [1, 1, 1]} : vector<4x8x8xf32> to vector<1x8x8xf32>
    %228 = vector.shape_cast %227 : vector<1x8x8xf32> to vector<8x8xf32>
    %229 = arith.truncf %228 : vector<8x8xf32> to vector<8x8xbf16>
    %230 = vector.extract_strided_slice %10 {offsets = [1, 0, 0], sizes = [1, 8, 32], strides = [1, 1, 1]} : vector<4x8x32xbf16> to vector<1x8x32xbf16>
    %231 = vector.shape_cast %230 : vector<1x8x32xbf16> to vector<8x32xbf16>
    %cst_99 = arith.constant dense<0.000000e+00> : vector<8x32xf32>
    %232 = tpu.matmul %229, %231, %cst_99 {dimension_numbers = #tpu.dot_dimension_numbers<[1], [0], [0], [1], [0, 0, 1, 1], [], []>} : vector<8x8xbf16>, vector<8x32xbf16>, vector<8x32xf32> -> vector<8x32xf32>
    %233 = arith.addf %226, %232 : vector<8x32xf32>
    %234 = vector.extract_strided_slice %218 {offsets = [2, 0, 0], sizes = [1, 8, 8], strides = [1, 1, 1]} : vector<4x8x8xf32> to vector<1x8x8xf32>
    %235 = vector.shape_cast %234 : vector<1x8x8xf32> to vector<8x8xf32>
    %236 = arith.truncf %235 : vector<8x8xf32> to vector<8x8xbf16>
    %237 = vector.extract_strided_slice %10 {offsets = [2, 0, 0], sizes = [1, 8, 32], strides = [1, 1, 1]} : vector<4x8x32xbf16> to vector<1x8x32xbf16>
    %238 = vector.shape_cast %237 : vector<1x8x32xbf16> to vector<8x32xbf16>
    %cst_100 = arith.constant dense<0.000000e+00> : vector<8x32xf32>
    %239 = tpu.matmul %236, %238, %cst_100 {dimension_numbers = #tpu.dot_dimension_numbers<[1], [0], [0], [1], [0, 0, 1, 1], [], []>} : vector<8x8xbf16>, vector<8x32xbf16>, vector<8x32xf32> -> vector<8x32xf32>
    %240 = arith.addf %233, %239 : vector<8x32xf32>
    %241 = vector.extract_strided_slice %218 {offsets = [3, 0, 0], sizes = [1, 8, 8], strides = [1, 1, 1]} : vector<4x8x8xf32> to vector<1x8x8xf32>
    %242 = vector.shape_cast %241 : vector<1x8x8xf32> to vector<8x8xf32>
    %243 = arith.truncf %242 : vector<8x8xf32> to vector<8x8xbf16>
    %244 = vector.extract_strided_slice %10 {offsets = [3, 0, 0], sizes = [1, 8, 32], strides = [1, 1, 1]} : vector<4x8x32xbf16> to vector<1x8x32xbf16>
    %245 = vector.shape_cast %244 : vector<1x8x32xbf16> to vector<8x32xbf16>
    %cst_101 = arith.constant dense<0.000000e+00> : vector<8x32xf32>
    %246 = tpu.matmul %243, %245, %cst_101 {dimension_numbers = #tpu.dot_dimension_numbers<[1], [0], [0], [1], [0, 0, 1, 1], [], []>} : vector<8x8xbf16>, vector<8x32xbf16>, vector<8x32xf32> -> vector<8x32xf32>
    %247 = arith.addf %240, %246 : vector<8x32xf32>
    %248 = vector.broadcast %12 : vector<1x32xf32> to vector<8x32xf32>
    %249 = arith.addf %247, %248 : vector<8x32xf32>
    %250 = arith.addf %249, %170 : vector<8x32xf32>
    %cst_102 = arith.constant dense<0.000000e+00> : vector<8xf32>
    %251 = vector.multi_reduction <add>, %250, %cst_102 [1] : vector<8x32xf32> to vector<8xf32>
    %252 = vector.shape_cast %251 : vector<8xf32> to vector<8x1xf32>
    %cst_103 = arith.constant 3.200000e+01 : f32
    %253 = vector.broadcast %cst_103 : f32 to vector<8x1xf32>
    %254 = arith.divf %252, %253 : vector<8x1xf32>
    %255 = vector.broadcast %254 : vector<8x1xf32> to vector<8x32xf32>
    %256 = arith.subf %250, %255 : vector<8x32xf32>
    %257 = arith.mulf %256, %256 : vector<8x32xf32>
    %cst_104 = arith.constant dense<0.000000e+00> : vector<8xf32>
    %258 = vector.multi_reduction <add>, %257, %cst_104 [1] : vector<8x32xf32> to vector<8xf32>
    %259 = vector.shape_cast %258 : vector<8xf32> to vector<8x1xf32>
    %cst_105 = arith.constant 3.200000e+01 : f32
    %260 = vector.broadcast %cst_105 : f32 to vector<8x1xf32>
    %261 = arith.divf %259, %260 : vector<8x1xf32>
    %262 = vector.broadcast %254 : vector<8x1xf32> to vector<8x32xf32>
    %263 = arith.subf %250, %262 : vector<8x32xf32>
    %cst_106 = arith.constant 9.99999974E-6 : f32
    %264 = vector.broadcast %cst_106 : f32 to vector<8x1xf32>
    %265 = arith.addf %261, %264 : vector<8x1xf32>
    %266 = math.rsqrt %265 : vector<8x1xf32>
    %267 = vector.broadcast %266 : vector<8x1xf32> to vector<8x32xf32>
    %268 = arith.mulf %263, %267 : vector<8x32xf32>
    %269 = vector.broadcast %14 : vector<1x32xf32> to vector<8x32xf32>
    %270 = arith.mulf %268, %269 : vector<8x32xf32>
    %271 = vector.broadcast %16 : vector<1x32xf32> to vector<8x32xf32>
    %272 = arith.addf %270, %271 : vector<8x32xf32>
    %273 = arith.truncf %272 : vector<8x32xf32> to vector<8x32xbf16>
    %cst_107 = arith.constant dense<0.000000e+00> : vector<8x128xf32>
    %274 = tpu.matmul %273, %18, %cst_107 {dimension_numbers = #tpu.dot_dimension_numbers<[1], [0], [0], [1], [0, 0, 1, 1], [], []>} : vector<8x32xbf16>, vector<32x128xbf16>, vector<8x128xf32> -> vector<8x128xf32>
    %275 = vector.broadcast %20 : vector<1x128xf32> to vector<8x128xf32>
    %276 = arith.addf %274, %275 : vector<8x128xf32>
    %cst_108 = arith.constant 0.000000e+00 : f32
    %277 = vector.broadcast %cst_108 : f32 to vector<8x128xf32>
    %278 = arith.maximumf %276, %277 : vector<8x128xf32>
    %279 = arith.truncf %278 : vector<8x128xf32> to vector<8x128xbf16>
    %cst_109 = arith.constant dense<0.000000e+00> : vector<8x32xf32>
    %280 = tpu.matmul %279, %22, %cst_109 {dimension_numbers = #tpu.dot_dimension_numbers<[1], [0], [0], [1], [0, 0, 1, 1], [], []>} : vector<8x128xbf16>, vector<128x32xbf16>, vector<8x32xf32> -> vector<8x32xf32>
    %281 = vector.broadcast %24 : vector<1x32xf32> to vector<8x32xf32>
    %282 = arith.addf %280, %281 : vector<8x32xf32>
    %283 = arith.addf %282, %272 : vector<8x32xf32>
    %cst_110 = arith.constant dense<0.000000e+00> : vector<8xf32>
    %284 = vector.multi_reduction <add>, %283, %cst_110 [1] : vector<8x32xf32> to vector<8xf32>
    %285 = vector.shape_cast %284 : vector<8xf32> to vector<8x1xf32>
    %cst_111 = arith.constant 3.200000e+01 : f32
    %286 = vector.broadcast %cst_111 : f32 to vector<8x1xf32>
    %287 = arith.divf %285, %286 : vector<8x1xf32>
    %288 = vector.broadcast %287 : vector<8x1xf32> to vector<8x32xf32>
    %289 = arith.subf %283, %288 : vector<8x32xf32>
    %290 = arith.mulf %289, %289 : vector<8x32xf32>
    %cst_112 = arith.constant dense<0.000000e+00> : vector<8xf32>
    %291 = vector.multi_reduction <add>, %290, %cst_112 [1] : vector<8x32xf32> to vector<8xf32>
    %292 = vector.shape_cast %291 : vector<8xf32> to vector<8x1xf32>
    %cst_113 = arith.constant 3.200000e+01 : f32
    %293 = vector.broadcast %cst_113 : f32 to vector<8x1xf32>
    %294 = arith.divf %292, %293 : vector<8x1xf32>
    %295 = vector.broadcast %287 : vector<8x1xf32> to vector<8x32xf32>
    %296 = arith.subf %283, %295 : vector<8x32xf32>
    %cst_114 = arith.constant 9.99999974E-6 : f32
    %297 = vector.broadcast %cst_114 : f32 to vector<8x1xf32>
    %298 = arith.addf %294, %297 : vector<8x1xf32>
    %299 = math.rsqrt %298 : vector<8x1xf32>
    %300 = vector.broadcast %299 : vector<8x1xf32> to vector<8x32xf32>
    %301 = arith.mulf %296, %300 : vector<8x32xf32>
    %302 = vector.broadcast %26 : vector<1x32xf32> to vector<8x32xf32>
    %303 = arith.mulf %301, %302 : vector<8x32xf32>
    %304 = vector.broadcast %28 : vector<1x32xf32> to vector<8x32xf32>
    %305 = arith.addf %303, %304 : vector<8x32xf32>
    %c1_115 = arith.constant 1 : index
    %c0_116 = arith.constant 0 : index
    %c0_117 = arith.constant 0 : index
    %306 = vector.load %arg17[%c1_115, %c0_116, %c0_117] : memref<2x8x32xf32, #tpu.memory_space<vmem>>, vector<1x8x32xf32>
    %307 = vector.shape_cast %306 : vector<1x8x32xf32> to vector<8x32xf32>
    %308 = vector.shape_cast %305 : vector<8x32xf32> to vector<1x8x32xf32>
    tpu.vector_store %arg17[%c1_115, %c0_116, %c0_117], %308 {strides = array<i32>} : memref<2x8x32xf32, #tpu.memory_space<vmem>>, vector<1x8x32xf32>,
    return
  }
  func.func @transform_0(%arg0: i32, %arg1: i32) -> (i32, i32, i32) {
    %c0_i32 = arith.constant 0 : i32
    %c0_i32_0 = arith.constant 0 : i32
    %c0_i32_1 = arith.constant 0 : i32
    return %arg0, %c0_i32, %c0_i32_0 : i32, i32, i32
  }
  func.func @transform_1(%arg0: i32, %arg1: i32) -> (i32, i32, i32) {
    %c0_i32 = arith.constant 0 : i32
    %c0_i32_0 = arith.constant 0 : i32
    %c0_i32_1 = arith.constant 0 : i32
    return %arg0, %c0_i32, %c0_i32_0 : i32, i32, i32
  }
  func.func @transform_2(%arg0: i32, %arg1: i32) -> (i32, i32, i32) {
    %c0_i32 = arith.constant 0 : i32
    %c0_i32_0 = arith.constant 0 : i32
    %c0_i32_1 = arith.constant 0 : i32
    return %arg1, %c0_i32, %c0_i32_0 : i32, i32, i32
  }
  func.func @transform_3(%arg0: i32, %arg1: i32) -> (i32, i32, i32) {
    %c0_i32 = arith.constant 0 : i32
    %c0_i32_0 = arith.constant 0 : i32
    %c0_i32_1 = arith.constant 0 : i32
    return %arg1, %c0_i32, %c0_i32_0 : i32, i32, i32
  }
  func.func @transform_4(%arg0: i32, %arg1: i32) -> (i32, i32, i32) {
    %c0_i32 = arith.constant 0 : i32
    %c0_i32_0 = arith.constant 0 : i32
    %c0_i32_1 = arith.constant 0 : i32
    return %arg1, %c0_i32, %c0_i32_0 : i32, i32, i32
  }
  func.func @transform_5(%arg0: i32, %arg1: i32) -> (i32, i32, i32, i32) {
    %c0_i32 = arith.constant 0 : i32
    %c0_i32_0 = arith.constant 0 : i32
    %c0_i32_1 = arith.constant 0 : i32
    %c0_i32_2 = arith.constant 0 : i32
    return %arg1, %c0_i32, %c0_i32_0, %c0_i32_1 : i32, i32, i32, i32
  }
  func.func @transform_6(%arg0: i32, %arg1: i32) -> (i32, i32, i32) {
    %c0_i32 = arith.constant 0 : i32
    %c0_i32_0 = arith.constant 0 : i32
    %c0_i32_1 = arith.constant 0 : i32
    return %arg1, %c0_i32, %c0_i32_0 : i32, i32, i32
  }
  func.func @transform_7(%arg0: i32, %arg1: i32) -> (i32, i32, i32) {
    %c0_i32 = arith.constant 0 : i32
    %c0_i32_0 = arith.constant 0 : i32
    %c0_i32_1 = arith.constant 0 : i32
    return %arg1, %c0_i32, %c0_i32_0 : i32, i32, i32
  }
  func.func @transform_8(%arg0: i32, %arg1: i32) -> (i32, i32, i32) {
    %c0_i32 = arith.constant 0 : i32
    %c0_i32_0 = arith.constant 0 : i32
    %c0_i32_1 = arith.constant 0 : i32
    return %arg1, %c0_i32, %c0_i32_0 : i32, i32, i32
  }
  func.func @transform_9(%arg0: i32, %arg1: i32) -> (i32, i32, i32) {
    %c0_i32 = arith.constant 0 : i32
    %c0_i32_0 = arith.constant 0 : i32
    %c0_i32_1 = arith.constant 0 : i32
    return %arg1, %c0_i32, %c0_i32_0 : i32, i32, i32
  }
  func.func @transform_10(%arg0: i32, %arg1: i32) -> (i32, i32, i32) {
    %c0_i32 = arith.constant 0 : i32
    %c0_i32_0 = arith.constant 0 : i32
    %c0_i32_1 = arith.constant 0 : i32
    return %arg1, %c0_i32, %c0_i32_0 : i32, i32, i32
  }
  func.func @transform_11(%arg0: i32, %arg1: i32) -> (i32, i32, i32) {
    %c0_i32 = arith.constant 0 : i32
    %c0_i32_0 = arith.constant 0 : i32
    %c0_i32_1 = arith.constant 0 : i32
    return %arg1, %c0_i32, %c0_i32_0 : i32, i32, i32
  }
  func.func @transform_12(%arg0: i32, %arg1: i32) -> (i32, i32, i32) {
    %c0_i32 = arith.constant 0 : i32
    %c0_i32_0 = arith.constant 0 : i32
    %c0_i32_1 = arith.constant 0 : i32
    return %arg1, %c0_i32, %c0_i32_0 : i32, i32, i32
  }
  func.func @transform_13(%arg0: i32, %arg1: i32) -> (i32, i32, i32) {
    %c0_i32 = arith.constant 0 : i32
    %c0_i32_0 = arith.constant 0 : i32
    %c0_i32_1 = arith.constant 0 : i32
    return %arg1, %c0_i32, %c0_i32_0 : i32, i32, i32
  }
  func.func @transform_14(%arg0: i32, %arg1: i32) -> (i32, i32, i32) {
    %c0_i32 = arith.constant 0 : i32
    %c0_i32_0 = arith.constant 0 : i32
    %c0_i32_1 = arith.constant 0 : i32
    return %arg1, %c0_i32, %c0_i32_0 : i32, i32, i32
  }
  func.func @transform_15(%arg0: i32, %arg1: i32) -> (i32, i32, i32) {
    %c0_i32 = arith.constant 0 : i32
    %c0_i32_0 = arith.constant 0 : i32
    %c0_i32_1 = arith.constant 0 : i32
    return %arg0, %c0_i32, %c0_i32_0 : i32, i32, i32
  }
}

</mosaic_0001>

<bundles_post_ra>
// kernel: encoder_forward.1
= control target key start
LH: loop header
LB: loop body
LE: loop exit
PB: predicated region body
PF: predicated region fallthrough
CT: control target
= control target key end

     0   :  { %s4553_s0 = inlined_call_operand.vmem [shape: f32[2,8,32], index: 0, kind: input, shape index: {}]   ;;  %s4554_s1 = inlined_call_operand.vmem [shape: s32[2,1,8], index: 1, kind: input, shape index: {}]   ;;  %s4555_s2 = inlined_call_operand.vmem [shape: bf16[2,8,8], index: 2, kind: input, shape index: {}]   ;;  %s4556_s3 = inlined_call_operand.vmem [shape: bf16[2,8,8], index: 3, kind: input, shape index: {}]   ;;  %s4557_s4 = inlined_call_operand.vmem [shape: bf16[2,8,8], index: 4, kind: input, shape index: {}]   ;;  %s4558_s5 = inlined_call_operand.vmem [shape: bf16[2,4,8,32], index: 5, kind: input, shape index: {}]   ;;  %s4559_s6 = inlined_call_operand.vmem [shape: f32[2,1,32], index: 6, kind: input, shape index: {}]   ;;  %s4560_s7 = inlined_call_operand.vmem [shape: f32[2,1,32], index: 7, kind: input, shape index: {}]   ;;  %s4561_s8 = inlined_call_operand.vmem [shape: f32[2,1,32], index: 8, kind: input, shape index: {}]   ;;  %s4562_s9 = inlined_call_operand.vmem [shape: bf16[2,32,128], index: 9, kind: input, shape index: {}]   ;;  %s4563_s10 = inlined_call_operand.vmem [shape: f32[2,1,128], index: 10, kind: input, shape index: {}]   ;;  %s4564_s11 = inlined_call_operand.vmem [shape: bf16[2,128,32], index: 11, kind: input, shape index: {}]   ;;  %s4565_s12 = inlined_call_operand.vmem [shape: f32[2,1,32], index: 12, kind: input, shape index: {}]   ;;  %s4566_s13 = inlined_call_operand.vmem [shape: f32[2,1,32], index: 13, kind: input, shape index: {}]   ;;  %s4567_s14 = inlined_call_operand.vmem [shape: f32[2,1,32], index: 14, kind: input, shape index: {}]   ;;  %s4568_s15 = inlined_call_operand.hbm [shape: f32[2,8,32], index: 15, kind: output, shape index: {}]  }
   0x1   :  { %4574 = sst [smem:[#allocation9_spill]] %s4553_s0 }
   0x2   :  { %4575 = sst [smem:[#allocation10_spill]] %s4554_s1 }
   0x3   :  { %4576 = sst [smem:[#allocation11_spill]] %s4557_s4 }
   0x4   :  { %4577 = sst [smem:[#allocation12_spill]] %s4558_s5 }
   0x5   :  { %4578 = sst [smem:[#allocation13_spill]] %s4562_s9 }
   0x6   :  { %4579 = sst [smem:[#allocation14_spill]] %s4567_s14 }
   0x7   :  { %4580 = sst [smem:[#allocation15_spill]] %s4568_s15 }
   0x8   :  { %20 = vsyncpa [#allocation3], 0  ;;  %s4037_s18 = smov 0   ;;  %s4039_s19 = smov 0  }
   0x9   :  { %s4041_s20 = smov 0  }
   0xa LB: > { %4581 = sst [smem:[#allocation5_spill]] %s3942_s18  ;;  %s35_s22 = sadd.s32 1, %s3946_s19  ;;  %s3950_s20 = sphi %s4041_s20, %s26_s20   ;;  %s3946_s19 = sphi %s4039_s19, %s4605_s19   ;;  %s3942_s18 = sphi %s4037_s18, %s4604_s18  }
   0xb   : > { %4582 = sst [smem:[#allocation6_spill]] %s3946_s19  ;;  %p36_p0 = scmp.ge.s32.totalorder %s35_s22, 2 }
   0xc   : > { %4583 = sst [smem:[#allocation7_spill]] %s3950_s20  ;;  %p3317_p1 = scmp.ge.s32.totalorder %s3950_s20, 1 }
   0xd   : > { %p574_p2 = scmp.lt.s32.totalorder %s3950_s20, 3  ;;  %s4607_s22 = smov (%p36_p0, %s35_s22), 0 }
   0xe   : > { %4584 = sst [smem:[#allocation8_spill]] %s4607_s22 }
   0xf   : > { %p575_p3 = pnand %p3317_p1, %p574_p2 }
  0x10   : > { %p680_p4 = scmp.lt.s32.totalorder (!%p575_p3), %s3942_s18, 1  ;;  %s4585_s4 = sld [smem:[#allocation11_spill]] (!%p575_p3) }
  0x11   : > { %578 = sbr.rel (%p575_p3) target bundleno = 3627 (0xe2b), region = 80  ;;  %s4586_s5 = sld [smem:[#allocation12_spill]] (!%p575_p3) }
  0x12   : > { %s4587_s9 = sld [smem:[#allocation13_spill]] (!%p575_p3) }
  0x13   : > { %s4588_s27 = sld [smem:[#allocation14_spill]] (!%p575_p3) }
  0x14   : > { %s4589_s15 = sld [smem:[#allocation5_spill]] (!%p575_p3) }
  0x16   : > { %s4060_s23 = scalar_select %p680_p4, %s3942_s18, 1 }
  0x18   : > { %s4063_s24 = sshll.u32 %s4060_s23, 2  ;;  %s3412_s25 = sshll.u32 %s4060_s23, 4 }
  0x19   : > { %s691_s22 = scalar_lea.vmem %s4585_s4, %s4063_s24  ;;  %s4081_s20 = scalar_lea.vmem %s4586_s5, %s3412_s25 }
  0x1a   : > { %s4098_s17 = scalar_lea.vmem %s4587_s9, %s3412_s25  ;;  %s3414_s5 = sshll.u32 %s4060_s23, 6 }
  0x1b   : > { %s4108_s18 = scalar_lea.vmem %s4564_s11, %s3414_s5  ;;  %s721_s28 = scalar_lea.vmem %s4565_s12, %s4060_s23 }
  0x1c   : > { %s724_s16 = scalar_lea.vmem %s4566_s13, %s4060_s23  ;;  %s727_s9 = scalar_lea.vmem %s4588_s27, %s4060_s23 }
  0x1d   : > { %p3327_p5 = scmp.ne.s32.totalorder %s4589_s15, 0 }
  0x1e   : > { %s4590_s0 = sld [smem:[#allocation9_spill]] (!%p3327_p5) }
  0x1f   : > { %733 = sbr.rel (%p3327_p5) target bundleno = 38 (0x26), region = 84 }
  0x24   : > { %v734_v0 = vld [vmem:[%s4590_s0] sm:$0xff]  ;;  %vm736_vm0 = vcmask 261120   ;;  %v735_v1 = vld [vmem:[%s4590_s0 + $0x8] sm:$0xff] }
  0x25   : > { %737 = vst.msk [vmem:[#allocation2] sm:$0xff] %vm736_vm0, %v734_v0  ;;  %738 = vst.msk [vmem:[#allocation2 + $0x8] sm:$0xff] %vm736_vm0, %v735_v1 }
  0x26 PF: > { %v4132_v7 = vld [vmem:[%s691_s22] sm:$0xf]  ;;  %vm946_vm1 = vcmask 1043456   ;;  %s4591_s30 = scalar_lea.vmem %s4555_s2, %s4063_s24  ;;  %s4592_s26 = scalar_lea.vmem %s4556_s3, %s4063_s24  ;;  %vm939_vm2 = vcmask 64512   ;;  %v3952_v23 = vmov 0.0   ;;  %vm3953_vm3 = vmmov 0  }
  0x27   : > { %v4139_v8 = vld [vmem:[%s4591_s30] sm:$0xf]  ;;  %3765 = vmatprep.subr.msk.bf16.mxu1 %vm946_vm1, %v4132_v7  ;;  %v4147_v10 = vsel %vm946_vm1, %v4132_v7, 0  ;;  %v1140_v52 = vlaneseq  ;;  %s4593_s25 = sld [smem:[#allocation10_spill]]  ;;  %s4594_s15 = scalar_lea.vmem %s4559_s6, %s4060_s23  ;;  %vm1783_vm5 = vcmask 261120  }
  0x28   : > { %3767 = vmatprep.subr.msk.bf16.mxu0 %vm946_vm1, %v4139_v8  ;;  %v4151_v11 = vsel %vm946_vm1, %v4139_v8, 0  ;;  %3530 = vmatpush3.bf16.msra.mxu1 %v4147_v10  ;;  %v4160_v13 = vld [vmem:[%s4592_s26] sm:$0xf]  ;;  %s4595_s5 = scalar_lea.vmem %s4560_s7, %s4060_s23  ;;  %s4596_s27 = scalar_lea.vmem %s4561_s8, %s4060_s23 }
  0x29   : > { %3542 = vmatpush3.bf16.msra.mxu0 %v4151_v11  ;;  %3766 = vmatprep.subr.msk.bf16.mxu1 %vm946_vm1, %v4160_v13  ;;  %v4168_v22 = vsel %vm946_vm1, %v4160_v13, 0  ;;  %v4212_v54 = vshrl.u32 %v1140_v52, 7  ;;  %s4597_s14 = scalar_lea.vmem %s4563_s10, %s4060_s23  ;;  %s3954_s23 = smov [#allocation2]  }
  0x2a   : > { %3565 = vmatprep.subr.bf16.mxu0 %v3952_v23 }
  0x2b   : > { %v1142_v55 = vsub.s32 0, %v4212_v54 }
  0x2c   : > { %v4129_v2 = vld [vmem:[#allocation2] sm:$0xff] }
  0x2d   : > { %777 = vxpose.xlu0.b32.start.end [1/1] (short) (narrow) %v4129_v2, 32  ;;  %v774_v53 = vld [vmem:[%s4593_s25] sm:$0x1] }
  0x2e   : > { %vm775_vm4 = vcmp.eq.s32.totalorder %v774_v53, 0 }
  0x2f   : > { %v776_v56 = vsel %vm775_vm4, -1e+25, %v3952_v23 }
  0x30   : > { %v1143_v57 = vrot.slane %v776_v56, %v1142_v55  ;;  %v742_v56 = vld [vmem:[%s4081_s20] sm:$0xf] }
  0xa9   : > { %v793_v3 = vpop.trf.xlu0 }
  0xad   : > { %v794_v4 = vpop.trf.xlu0 }
  0xae   : > { %v3806_v5 = vpack.i.bf16 %v794_v4, %v793_v3 }
  0xb0   : > { %3807 = vxpose.xlu0.b32.start.end [1/1] (short) (narrow) %v3806_v5, 8 }
  0xb1   : > { %v795_v6 = vpop.trf.xlu0 }
  0xb5   : > { %v796_v9 = vpop.trf.xlu0 }
  0xb6   : > { %v3813_v12 = vpack.i.bf16 %v796_v9, %v795_v6 }
  0xb8   : > { %3814 = vxpose.xlu1.b32.start.end [1/1] (short) (narrow) %v3813_v12, 8 }
 0x12c   : > { %v3808_v14 = vpop.trf.xlu0 }
 0x12d   : > { %v3812_v15 = vunpack.i.h.bf16 %v3808_v14  ;;  %v3809_v16 = vunpack.i.l.bf16 %v3808_v14 }
 0x12f   : > { %v937_v17 = vpack.c.bf16 %v3812_v15, %v3809_v16 }
 0x131   : > { %3531 = vmatprep.mubr.msk.bf16.mxu1 %vm939_vm2, %v937_v17  ;;  %3543 = vmatprep.mubr.msk.bf16.mxu0 %vm939_vm2, %v937_v17 }
 0x134   : > { %v3815_v18 = vpop.trf.xlu1 }
 0x135   : > { %v3819_v19 = vunpack.i.h.bf16 %v3815_v18  ;;  %v3816_v20 = vunpack.i.l.bf16 %v3815_v18 }
 0x137   : > { %v938_v21 = vpack.c.bf16 %v3819_v19, %v3816_v20 }
 0x139   : > { %3532 = vmatmul.mubr.msk.bf16.vlgmr.msra.gmra.mxu1 %vm939_vm2, %v938_v21  ;;  %3544 = vmatmul.mubr.msk.bf16.vlgmr.msra.gmra.mxu0 %vm939_vm2, %v938_v21 }
 0x13a   : > { %3536 = vmatpush3.bf16.msra.mxu1 %v4168_v22  ;;  %3537 = vmatprep.mubr.msk.bf16.mxu1 %vm939_vm2, %v937_v17 }
 0x13b   : > { %3547 = vmatprep.subr.bf16.mxu1 %v3952_v23  ;;  %3567 = vmatprep.mubr.msk.bf16.mxu0 %vm3953_vm3, %v3952_v23 }
 0x141   : > { %3538 = vmatmul.mubr.msk.bf16.vlgmr.msra.gmra.mxu1 %vm939_vm2, %v938_v21 }
 0x142   : > { %3549 = vmatprep.mubr.msk.bf16.mxu1 %vm3953_vm3, %v3952_v23 }
 0x1f9   : > { %v3533_v24 = vpop.f32.mrf.mxu1  ;;  %v4181_v26 = vpop.f32.mrf.mxu0 }
 0x1fa   : > { %v3417_v50 = vpack.c.bf16 %v3533_v24, %v3533_v24 }
 0x1fb   : > { %v984_v25 = vpop.f32.mrf.mxu1  ;;  %v1112_v29 = vpop.f32.mrf.mxu0 }
 0x1fc   : > { %v3415_v41 = vpack.c.bf16 %v984_v25, %v984_v25  ;;  %v3423_v49 = vpack.c.bf16 %v1112_v29, %v1112_v29 }
 0x1fd   : > { %v3534_v27 = vpop.f32.mrf.mxu1  ;;  %v4183_v33 = vpop.f32.mrf.mxu0 }
 0x1fe   : > { %v3418_v43 = vpack.c.bf16 %v3534_v27, %v3534_v27  ;;  %v1393_v51 = vsel %vm946_vm1, %v3423_v49, 0 }
 0x1ff   : > { %v987_v28 = vpop.f32.mrf.mxu1  ;;  %v1115_v39 = vpop.f32.mrf.mxu0 }
 0x200   : > { %v3424_v42 = vpack.c.bf16 %v1115_v39, %v1115_v39  ;;  %v3416_v47 = vpack.c.bf16 %v987_v28, %v987_v28 }
 0x201   : > { %v3539_v30 = vpop.f32.mrf.mxu1 }
 0x202   : > { %v1439_v45 = vsel %vm946_vm1, %v3424_v42, 0  ;;  %v3421_v46 = vpack.c.bf16 %v3539_v30, %v3539_v30 }
 0x203   : > { %v1048_v31 = vpop.f32.mrf.mxu1 }
 0x204   : > { %v3419_v32 = vpack.c.bf16 %v1048_v31, %v1048_v31  ;;  %v1241_v48 = vsel %vm939_vm2, %v3421_v46, 0 }
 0x205   : > { %v3540_v34 = vpop.f32.mrf.mxu1 }
 0x206   : > { %v1149_v35 = vsel %vm939_vm2, %v3419_v32, 0  ;;  %v3422_v36 = vpack.c.bf16 %v3540_v34, %v3540_v34 }
 0x207   : > { %v1051_v37 = vpop.f32.mrf.mxu1  ;;  %3548 = vmatpush3.bf16.xpose.msra.mxu1 %v1149_v35 }
 0x208   : > { %v1287_v38 = vsel %vm939_vm2, %v3422_v36, 0  ;;  %3553 = vmatprep.subr.bf16.mxu1 %v3952_v23  ;;  %v3420_v40 = vpack.c.bf16 %v1051_v37, %v1051_v37  ;;  %v3425_v36 = vpack.c.bf16 %v4181_v26, %v4181_v26  ;;  %v3426_v26 = vpack.c.bf16 %v4183_v33, %v4183_v33 }
 0x209   : > { %3566 = vmatpush3.bf16.xpose.msra.mxu0 %v1287_v38 }
 0x20a   : > { %3577 = vmatprep.subr.bf16.mxu0 %v3952_v23  ;;  %v1195_v44 = vsel %vm939_vm2, %v3420_v40, 0  ;;  %v1485_v42 = vsel %vm946_vm1, %v3425_v36, 0 }
 0x20e   : > { %3550 = vmatmul.mubr.msk.bf16.vlgmr.msra.gmra.mxu1 %vm939_vm2, %v3415_v41 }
 0x20f   : > { %3554 = vmatpush3.bf16.xpose.msra.mxu1 %v1195_v44  ;;  %3555 = vmatprep.mubr.msk.bf16.mxu1 %vm3953_vm3, %v3952_v23 }
 0x210   : > { %3568 = vmatmul.mubr.msk.bf16.vlgmr.msra.gmra.mxu0 %vm939_vm2, %v3418_v43  ;;  %3559 = vmatprep.subr.bf16.mxu1 %v3952_v23 }
 0x211   : > { %3578 = vmatpush3.bf16.msra.mxu0 %v1439_v45  ;;  %3579 = vmatprep.mubr.msk.bf16.mxu0 %vm3953_vm3, %v3952_v23 }
 0x212   : > { %3589 = vmatprep.subr.bf16.mxu0 %v3952_v23 }
 0x216   : > { %3556 = vmatmul.mubr.msk.bf16.vlgmr.msra.gmra.mxu1 %vm939_vm2, %v3416_v47  ;;  %v1531_v47 = vsel %vm946_vm1, %v3426_v26, 0  ;;  %v744_v26 = vld [vmem:[%s4081_s20 + $0x8] sm:$0xf] }
 0x217   : > { %3560 = vmatpush3.bf16.xpose.msra.mxu1 %v1241_v48  ;;  %3561 = vmatprep.mubr.msk.bf16.mxu1 %vm3953_vm3, %v3952_v23 }
 0x218   : > { %3571 = vmatprep.subr.bf16.mxu1 %v3952_v23 }
 0x21e   : > { %3562 = vmatmul.mubr.msk.bf16.vlgmr.msra.gmra.mxu1 %vm939_vm2, %v3417_v50 }
 0x21f   : > { %3572 = vmatpush3.bf16.msra.mxu1 %v1393_v51  ;;  %3573 = vmatprep.mubr.msk.bf16.mxu1 %vm3953_vm3, %v3952_v23 }
 0x220   : > { %3583 = vmatprep.subr.bf16.mxu1 %v3952_v23 }
 0x2ce   : > { %v1185_v58 = vpop.f32.mrf.mxu1 }
 0x2cf   : > { %v1186_v59 = vadd.f32 %v1185_v58, %v1143_v57  ;;  %v743_v58 = vld [vmem:[%s4081_s20 + $0x4] sm:$0xf] }
 0x2d0   : > { %v3551_v60 = vpop.f32.mrf.mxu1  ;;  %v1323_v61 = vpop.f32.mrf.mxu0 }
 0x2d1   : > { %v1329_v62 = vsel %vm939_vm2, %v1186_v59, -inf  ;;  %v1324_v19 = vadd.f32 %v1323_v61, %v1143_v57 }
 0x2d2   : > { %v3569_v63 = vpop.f32.mrf.mxu0  ;;  %1330 = vmax.xlane.f32.xlu1 %v1329_v62  ;;  %v1188_v0 = vpop.f32.mrf.mxu1 }
 0x2d3   : > { %v1338_v25 = vsel %vm939_vm2, %v1324_v19, -inf }
 0x2d4   : > { %v3552_v1 = vpop.f32.mrf.mxu1  ;;  %v1326_v3 = vpop.f32.mrf.mxu0 }
 0x2d6   : > { %v1231_v4 = vpop.f32.mrf.mxu1  ;;  %v3570_v5 = vpop.f32.mrf.mxu0 }
 0x2d7   : > { %v1232_v6 = vadd.f32 %v1231_v4, %v1143_v57 }
 0x2d8   : > { %v3557_v9 = vpop.f32.mrf.mxu1 }
 0x2d9   : > { %v1332_v12 = vsel %vm939_vm2, %v1232_v6, -inf }
 0x2da   : > { %1333 = vmax.xlane.f32.xlu0 %v1332_v12  ;;  %v1234_v14 = vpop.f32.mrf.mxu1 }
 0x2dc   : > { %v3558_v15 = vpop.f32.mrf.mxu1 }
 0x2de   : > { %v1277_v16 = vpop.f32.mrf.mxu1 }
 0x2df   : > { %v1278_v17 = vadd.f32 %v1277_v16, %v1143_v57  ;;  %v4248_v57 = vsel %vm946_vm1, %v742_v56, 0 }
 0x2e0   : > { %v3563_v18 = vpop.f32.mrf.mxu1 }
 0x2e1   : > { %v1335_v20 = vsel %vm939_vm2, %v1278_v17, -inf }
 0x2e2   : > { %1336 = vmax.xlane.f32.xlu1 %v1335_v20  ;;  %v1280_v21 = vpop.f32.mrf.mxu1 }
 0x2e4   : > { %v3564_v24 = vpop.f32.mrf.mxu1 }
 0x2e6   : > { %1339 = vmax.xlane.f32.xlu1 %v1338_v25 }
 0x35b   : > { %v1331_v27 = vpop.xlane.xlu1 %1330 }
 0x35c   : > { %v1353_v28 = vsub.f32 %v1186_v59, %v1331_v27  ;;  %v4254_v59 = vsel %vm946_vm1, %v743_v58, 0  ;;  %v1341_v60 = vsub.f32 -inf, %v1331_v27 }
 0x35e   : > { %v1357_v29 = vmul.f32 1.442695, %v1353_v28  ;;  %v1345_v61 = vmul.f32 1.442695, %v1341_v60 }
 0x360   : > { %3844 = vpow2.f32 %v1357_v29 }
 0x363   : > { %v1334_v30 = vpop.xlane.xlu0 %1333 }
 0x364   : > { %v1354_v31 = vsub.f32 %v1232_v6, %v1334_v30  ;;  %v1342_v62 = vsub.f32 -inf, %v1334_v30 }
 0x366   : > { %v1359_v32 = vmul.f32 1.442695, %v1354_v31  ;;  %v1347_v63 = vmul.f32 1.442695, %v1342_v62  ;;  %v745_v31 = vld [vmem:[%s4081_s20 + $0xc] sm:$0xf] }
 0x368   : > { %3846 = vpow2.f32 %v1359_v32 }
 0x36b   : > { %v1337_v34 = vpop.xlane.xlu1 %1336 }
 0x36c   : > { %v1355_v35 = vsub.f32 %v1278_v17, %v1337_v34  ;;  %v1343_v0 = vsub.f32 -inf, %v1337_v34 }
 0x36d   : > { %v3845_v37 = vpop.eup %3844 }
 0x36e   : > { %v1361_v38 = vmul.f32 1.442695, %v1355_v35  ;;  %v1385_v40 = vpack.c.bf16 %v3845_v37, %v3845_v37  ;;  %v1369_v48 = vsel %vm939_vm2, %v3845_v37, 0.0  ;;  %v1349_v3 = vmul.f32 1.442695, %v1343_v0 }
 0x36f   : > { %v1340_v39 = vpop.xlane.xlu1 %1339 }
 0x370   : > { %v1356_v41 = vsub.f32 %v1324_v19, %v1340_v39  ;;  %3848 = vpow2.f32 %v1361_v38  ;;  %3574 = vmatmul.mubr.msk.bf16.vlgmr.msra.gmra.mxu1 %vm939_vm2, %v1385_v40  ;;  %v1344_v4 = vsub.f32 -inf, %v1340_v39  ;;  %v4260_v38 = vsel %vm946_vm1, %v745_v31, 0 }
 0x371   : > { %3584 = vmatpush3.bf16.msra.mxu1 %v1485_v42  ;;  %3585 = vmatprep.mubr.msk.bf16.mxu1 %vm3953_vm3, %v3952_v23 }
 0x372   : > { %v1363_v43 = vmul.f32 1.442695, %v1356_v41  ;;  %3595 = vmatprep.subr.bf16.mxu1 %v3952_v23  ;;  %v1351_v9 = vmul.f32 1.442695, %v1344_v4 }
 0x374   : > { %3850 = vpow2.f32 %v1363_v43 }
 0x375   : > { %v3847_v44 = vpop.eup %3846  ;;  %3852 = vpow2.f32 %v1345_v61 }
 0x376   : > { %v1372_v45 = vsel %vm939_vm2, %v3847_v44, 0.0  ;;  %v1386_v46 = vpack.c.bf16 %v3847_v44, %v3847_v44  ;;  %3854 = vpow2.f32 %v1347_v63 }
 0x377   : > { %1373 = vadd.xlane.f32.xlu1 %v1372_v45  ;;  %3856 = vpow2.f32 %v1349_v3 }
 0x378   : > { %3580 = vmatmul.mubr.msk.bf16.vlgmr.msra.gmra.mxu0 %vm939_vm2, %v1386_v46  ;;  %3858 = vpow2.f32 %v1351_v9 }
 0x379   : > { %3590 = vmatpush3.bf16.msra.mxu0 %v1531_v47  ;;  %3591 = vmatprep.mubr.msk.bf16.mxu0 %vm3953_vm3, %v3952_v23  ;;  %v4269_v47 = vsel %vm946_vm1, %v744_v26, 0  ;;  %v4297_v26 = vld [vmem:[%s4098_s17 + $0x8] sm:$0xff]  }
 0x37a   : > { %3601 = vmatprep.subr.bf16.mxu0 %v3952_v23 }
 0x37b   : > { %1370 = vadd.xlane.f32.xlu1 %v1369_v48 }
 0x37d   : > { %v3849_v33 = vpop.eup %3848 }
 0x37e   : > { %v1375_v49 = vsel %vm939_vm2, %v3849_v33, 0.0  ;;  %v1387_v50 = vpack.c.bf16 %v3849_v33, %v3849_v33 }
 0x37f   : > { %1376 = vadd.xlane.f32.xlu1 %v1375_v49 }
 0x380   : > { %3586 = vmatmul.mubr.msk.bf16.vlgmr.msra.gmra.mxu1 %vm939_vm2, %v1387_v50 }
 0x381   : > { %v3851_v51 = vpop.eup %3850  ;;  %3597 = vmatprep.mubr.msk.bf16.mxu1 %vm3953_vm3, %v3952_v23  ;;  %3596 = vmatpush3.bf16.msra.mxu1 %v4254_v59 }
 0x382   : > { %v1378_v52 = vsel %vm939_vm2, %v3851_v51, 0.0  ;;  %v1388_v53 = vpack.c.bf16 %v3851_v51, %v3851_v51  ;;  %3607 = vmatprep.subr.bf16.mxu1 %v3952_v23  ;;  %v3853_v5 = vpop.eup %3852 }
 0x383   : > { %1379 = vadd.xlane.f32.xlu0 %v1378_v52  ;;  %v1365_v12 = vmul.f32 0.0, %v3853_v5  ;;  %v3855_v15 = vpop.eup %3854 }
 0x384   : > { %3592 = vmatmul.mubr.msk.bf16.vlgmr.msra.gmra.mxu0 %vm939_vm2, %v1388_v53  ;;  %v1366_v16 = vmul.f32 0.0, %v3855_v15  ;;  %v3857_v18 = vpop.eup %3856 }
 0x385   : > { %3603 = vmatprep.mubr.msk.bf16.mxu0 %vm3953_vm3, %v3952_v23  ;;  %3602 = vmatpush3.bf16.msra.mxu0 %v4248_v57  ;;  %v1367_v20 = vmul.f32 0.0, %v3857_v18  ;;  %v3859_v21 = vpop.eup %3858 }
 0x386   : > { %3613 = vmatprep.subr.bf16.mxu0 %v3952_v23  ;;  %v1368_v32 = vmul.f32 0.0, %v3859_v21 }
 0x400   : > { %v1374_v1 = vpop.xlane.xlu1 %1373 }
 0x401   : > { %v1382_v17 = vadd.f32 %v1374_v1, %v1366_v16 }
 0x404   : > { %v1371_v6 = vpop.xlane.xlu1 %1370 }
 0x405   : > { %v1381_v14 = vadd.f32 %v1371_v6, %v1365_v12 }
 0x407   : > { %3860 = vrcp.f32 %v1381_v14 }
 0x408   : > { %3862 = vrcp.f32 %v1382_v17  ;;  %v1377_v19 = vpop.xlane.xlu1 %1376 }
 0x409   : > { %v1383_v25 = vadd.f32 %v1377_v19, %v1367_v20 }
 0x40b   : > { %3864 = vrcp.f32 %v1383_v25  ;;  %v4287_v25 = vld [vmem:[%s4594_s15] ss:$0 sm:$0xff] }
 0x40c   : > { %v1380_v29 = vpop.xlane.xlu0 %1379 }
 0x40d   : > { %v1384_v36 = vadd.f32 %v1380_v29, %v1368_v32 }
 0x40f   : > { %3866 = vrcp.f32 %v1384_v36 }
 0x414   : > { %v3861_v28 = vpop.eup %3860 }
 0x415   : > { %v3863_v42 = vpop.eup %3862 }
 0x418   : > { %v3865_v50 = vpop.eup %3864 }
 0x41c   : > { %v3867_v61 = vpop.eup %3866 }
 0x430   : > { %v1429_v24 = vpop.f32.mrf.mxu1 }
 0x431   : > { %v1573_v27 = vadd.f32 %v1429_v24, %v1365_v12 }
 0x432   : > { %v3575_v30 = vpop.f32.mrf.mxu1 }
 0x433   : > { %v1581_v34 = vmul.f32 %v3861_v28, %v1573_v27 }
 0x434   : > { %v1432_v35 = vpop.f32.mrf.mxu1 }
 0x435   : > { %v1585_v37 = vpack.c.bf16 %v1581_v34, %v1581_v34 }
 0x436   : > { %v3576_v39 = vpop.f32.mrf.mxu1 }
 0x437   : > { %3604 = vmatmul.mubr.msk.bf16.vlgmr.msra.gmra.mxu0 %vm939_vm2, %v1585_v37  ;;  %v4292_v37 = vld [vmem:[#allocation2 + $0x8] sm:$0xff] }
 0x438   : > { %v1475_v40 = vpop.f32.mrf.mxu0  ;;  %3614 = vmatpush3.bf16.msra.mxu0 %v4260_v38  ;;  %3615 = vmatprep.mubr.msk.bf16.mxu0 %vm3953_vm3, %v3952_v23 }
 0x439   : > { %v1574_v41 = vadd.f32 %v1475_v40, %v1366_v16  ;;  %3627 = vmatprep.subr.bf16.mxu0 %v3952_v23 }
 0x43a   : > { %v3581_v43 = vpop.f32.mrf.mxu0 }
 0x43b   : > { %v1582_v44 = vmul.f32 %v3863_v42, %v1574_v41 }
 0x43c   : > { %v1478_v45 = vpop.f32.mrf.mxu0 }
 0x43d   : > { %v1586_v46 = vpack.c.bf16 %v1582_v44, %v1582_v44  ;;  %v4301_v44 = vld [vmem:[%s4098_s17] sm:$0xff]  }
 0x43e   : > { %v3582_v48 = vpop.f32.mrf.mxu0 }
 0x43f   : > { %3598 = vmatmul.mubr.msk.bf16.vlgmr.msra.gmra.mxu1 %vm939_vm2, %v1586_v46 }
 0x440   : > { %v1521_v33 = vpop.f32.mrf.mxu1  ;;  %3608 = vmatpush3.bf16.msra.mxu1 %v4269_v47  ;;  %3609 = vmatprep.mubr.msk.bf16.mxu1 %vm3953_vm3, %v3952_v23 }
 0x441   : > { %v1575_v49 = vadd.f32 %v1521_v33, %v1367_v20  ;;  %3619 = vmatprep.subr.bf16.mxu1 %v3952_v23 }
 0x442   : > { %v3587_v51 = vpop.f32.mrf.mxu1 }
 0x443   : > { %v1583_v52 = vmul.f32 %v3865_v50, %v1575_v49  ;;  %v4308_v50 = vld [vmem:[%s4108_s18 + $0x38] sm:$0xff]   ;;  %v4312_v51 = vld [vmem:[%s4108_s18 + $0x30] sm:$0xff]  }
 0x444   : > { %v1524_v53 = vpop.f32.mrf.mxu1  ;;  %v1567_v56 = vpop.f32.mrf.mxu0 }
 0x445   : > { %v1679_v58 = vpack.c.bf16 %v1583_v52, %v1583_v52  ;;  %v1576_v60 = vadd.f32 %v1567_v56, %v1368_v32  ;;  %v4317_v52 = vld [vmem:[%s4108_s18 + $0x28] sm:$0xff]   ;;  %v4327_v53 = vld [vmem:[%s4108_s18 + $0x18] sm:$0xff]   ;;  %v4332_v56 = vld [vmem:[%s4108_s18 + $0x10] sm:$0xff]  }
 0x446   : > { %v3588_v62 = vpop.f32.mrf.mxu1  ;;  %v3593_v63 = vpop.f32.mrf.mxu0 }
 0x447   : > { %v1584_v0 = vmul.f32 %v3867_v61, %v1576_v60  ;;  %3610 = vmatmul.mubr.msk.bf16.vlgmr.msra.gmra.mxu1 %vm939_vm2, %v1679_v58  ;;  %v4342_v63 = vld [vmem:[%s4595_s5] ss:$0 sm:$0xff] }
 0x448   : > { %v1570_v1 = vpop.f32.mrf.mxu0  ;;  %3623 = vmatprep.mubr.msk.bf16.mxu1 %vm3953_vm3, %v3952_v23  ;;  %3620 = vmatpush3.bf16.msra.mxu1 %v4297_v26 }
 0x449   : > { %v1727_v3 = vpack.c.bf16 %v1584_v0, %v1584_v0  ;;  %3621 = vmatprep.subr.bf16.mxu1 %v3952_v23  ;;  %v4349_v1 = vld [vmem:[%s4596_s27] ss:$0 sm:$0xff] }
 0x44a   : > { %v3594_v4 = vpop.f32.mrf.mxu0 }
 0x44b   : > { %3616 = vmatmul.mubr.msk.bf16.vlgmr.msra.gmra.mxu0 %vm939_vm2, %v1727_v3 }
 0x44c   : > { %3643 = vmatprep.mubr.msk.bf16.mxu0 %vm3953_vm3, %v3952_v23  ;;  %3622 = vmatpush3.bf16.msra.mxu1 %v4301_v44 }
 0x44d   : > { %3768 = vmatprep.subr.msk.bf16.mxu1 %vm946_vm1, %v4132_v7  ;;  %3628 = vmatpush3.bf16.msra.mxu0 %v4308_v50  ;;  %v4322_v7 = vld [vmem:[%s4108_s18 + $0x20] sm:$0xff]  }
 0x44e   : > { %3629 = vmatprep.subr.bf16.mxu0 %v3952_v23 }
 0x451   : > { %3630 = vmatpush3.bf16.msra.mxu0 %v4312_v51 }
 0x452   : > { %3631 = vmatprep.subr.bf16.mxu0 %v3952_v23 }
 0x455   : > { %3632 = vmatpush3.bf16.msra.mxu0 %v4317_v52 }
 0x456   : > { %3633 = vmatprep.subr.bf16.mxu0 %v3952_v23 }
 0x459   : > { %3634 = vmatpush3.bf16.msra.mxu0 %v4322_v7 }
 0x45a   : > { %3635 = vmatprep.subr.bf16.mxu0 %v3952_v23 }
 0x45d   : > { %3636 = vmatpush3.bf16.msra.mxu0 %v4327_v53 }
 0x45e   : > { %3637 = vmatprep.subr.bf16.mxu0 %v3952_v23 }
 0x461   : > { %3638 = vmatpush3.bf16.msra.mxu0 %v4332_v56 }
 0x462   : > { %3639 = vmatprep.subr.bf16.mxu0 %v3952_v23 }
 0x4f7   : > { %v1673_v5 = vpop.f32.mrf.mxu0 }
 0x4f9   : > { %v3605_v6 = vpop.f32.mrf.mxu0 }
 0x4fb   : > { %v1676_v9 = vpop.f32.mrf.mxu0 }
 0x4fd   : > { %v3606_v12 = vpop.f32.mrf.mxu0 }
 0x4ff   : > { %v1627_v14 = vpop.f32.mrf.mxu1 }
 0x500   : > { %v1674_v19 = vadd.f32 %v1673_v5, %v1627_v14 }
 0x501   : > { %v3599_v15 = vpop.f32.mrf.mxu1 }
 0x503   : > { %v1630_v16 = vpop.f32.mrf.mxu1 }
 0x505   : > { %v3600_v17 = vpop.f32.mrf.mxu1 }
 0x507   : > { %v1720_v18 = vpop.f32.mrf.mxu1 }
 0x508   : > { %v1726_v21 = vadd.f32 %v1720_v18, %v1674_v19 }
 0x509   : > { %v3611_v20 = vpop.f32.mrf.mxu1 }
 0x50b   : > { %v1723_v24 = vpop.f32.mrf.mxu1  ;;  %v1768_v27 = vpop.f32.mrf.mxu0 }
 0x50c   : > { %v1774_v28 = vadd.f32 %v1768_v27, %v1726_v21 }
 0x50d   : > { %v3612_v29 = vpop.f32.mrf.mxu1  ;;  %v3617_v30 = vpop.f32.mrf.mxu0 }
 0x50e   : > { %v1781_v31 = vadd.f32 %v4287_v25, %v1774_v28 }
 0x50f   : > { %v1771_v32 = vpop.f32.mrf.mxu0 }
 0x510   : > { %v1782_v34 = vadd.f32 %v1781_v31, %v4129_v2 }
 0x511   : > { %v3618_v35 = vpop.f32.mrf.mxu0 }
 0x512   : > { %v1784_v36 = vsel %vm1783_vm5, %v1782_v34, 0.0 }
 0x513   : > { %1785 = vadd.xlane.f32.xlu1 %v1784_v36 }
 0x546   : > { %2005 = vxpose.xlu1.b32.start.end [1/1] (short) (narrow) %v4292_v37, 32 }
 0x59c   : > { %v1786_v39 = vpop.xlane.xlu1 %1785 }
 0x59d   : > { %v1788_v40 = vmul.f32 0.03125, %v1786_v39 }
 0x59f   : > { %v1789_v41 = vsub.f32 %v1782_v34, %v1788_v40 }
 0x5a1   : > { %v1790_v42 = vmul.f32 %v1789_v41, %v1789_v41 }
 0x5a3   : > { %v1791_v43 = vsel %vm1783_vm5, %v1790_v42, 0.0 }
 0x5a4   : > { %1792 = vadd.xlane.f32.xlu0 %v1791_v43 }
 0x5c2   : > { %v2021_v2 = vpop.trf.xlu1 }
 0x5c6   : > { %v2022_v45 = vpop.trf.xlu1 }
 0x5c7   : > { %v3820_v48 = vpack.i.bf16 %v2022_v45, %v2021_v2 }
 0x5ca   : > { %v2023_v46 = vpop.trf.xlu1 }
 0x5ce   : > { %v2024_v33 = vpop.trf.xlu1 }
 0x5cf   : > { %v3827_v49 = vpack.i.bf16 %v2024_v33, %v2023_v46 }
 0x5d1   : > { %3821 = vxpose.xlu0.b32.start.end [1/1] (short) (narrow) %v3820_v48, 8 }
 0x5d5   : > { %3828 = vxpose.xlu0.b32.start.end [1/1] (short) (narrow) %v3827_v49, 8 }
 0x62d   : > { %v1793_v58 = vpop.xlane.xlu0 %1792 }
 0x62e   : > { %v1794_v60 = vmul.f32 0.03125, %v1793_v58 }
 0x630   : > { %v1795_v61 = vadd.f32 1e-05, %v1794_v60 }
 0x632   : > { %3868 = vrsqrt.f32 %v1795_v61 }
 0x63f   : > { %v3869_v62 = vpop.eup %3868 }
 0x640   : > { %v1797_v0 = vmul.f32 %v3869_v62, %v1789_v41 }
 0x642   : > { %v1804_v3 = vmul.f32 %v4342_v63, %v1797_v0 }
 0x644   : > { %v4353_v4 = vadd.f32 %v4349_v1, %v1804_v3 }
 0x646   : > { %v1812_v5 = vpack.c.bf16 %v4353_v4, %v4353_v4 }
 0x648   : > { %3624 = vmatmul.mubr.msk.bf16.vlgmr.msra.gmra.mxu1 %vm1783_vm5, %v1812_v5 }
 0x649   : > { %3648 = vmatpush3.bf16.msra.mxu1 %v4147_v10  ;;  %v4375_v10 = vld [vmem:[%s4108_s18 + $0x8] sm:$0xff]  }
 0x64a   : > { %3769 = vmatprep.subr.msk.bf16.mxu1 %vm946_vm1, %v4160_v13  ;;  %3640 = vmatpush3.bf16.msra.mxu0 %v4375_v10 }
 0x64b   : > { %3641 = vmatprep.subr.bf16.mxu0 %v3952_v23 }
 0x64d   : > { %v3822_v6 = vpop.trf.xlu0 }
 0x64e   : > { %v3826_v9 = vunpack.i.h.bf16 %v3822_v6  ;;  %v3823_v12 = vunpack.i.l.bf16 %v3822_v6 }
 0x650   : > { %v2165_v14 = vpack.c.bf16 %v3826_v9, %v3823_v12 }
 0x651   : > { %v3829_v15 = vpop.trf.xlu0 }
 0x652   : > { %v3833_v16 = vunpack.i.h.bf16 %v3829_v15  ;;  %v3830_v17 = vunpack.i.l.bf16 %v3829_v15  ;;  %3649 = vmatprep.mubr.msk.bf16.mxu1 %vm939_vm2, %v2165_v14 }
 0x654   : > { %v2166_v18 = vpack.c.bf16 %v3833_v16, %v3830_v17  ;;  %v3376_v17 = vld [vmem:[%s4593_s25 + $0x1] sm:$0x1] }
 0x655   : > { %vm2003_vm6 = vcmp.eq.s32.totalorder %v3376_v17, 0 }
 0x656   : > { %3650 = vmatmul.mubr.msk.bf16.vlgmr.msra.gmra.mxu1 %vm939_vm2, %v2166_v18 }
 0x657   : > { %3654 = vmatpush3.bf16.msra.mxu1 %v4168_v22  ;;  %3655 = vmatprep.mubr.msk.bf16.mxu1 %vm939_vm2, %v2165_v14 }
 0x658   : > { %3770 = vmatprep.subr.msk.bf16.mxu1 %vm946_vm1, %v4139_v8  ;;  %v4380_v8 = vld [vmem:[%s4108_s18] sm:$0xff]  }
 0x659   : > { %3642 = vmatpush3.bf16.msra.mxu0 %v4380_v8 }
 0x65a   : > { %3671 = vmatprep.subr.bf16.mxu0 %v3952_v23 }
 0x65e   : > { %3656 = vmatmul.mubr.msk.bf16.vlgmr.msra.gmra.mxu1 %vm939_vm2, %v2166_v18 }
 0x65f   : > { %3661 = vmatprep.mubr.msk.bf16.mxu1 %vm939_vm2, %v2165_v14  ;;  %3660 = vmatpush3.bf16.msra.mxu1 %v4151_v11  ;;  %v4389_v11 = vld [vmem:[%s4597_s14] ss:$0 sm:$0xff] }
 0x660   : > { %3665 = vmatprep.subr.bf16.mxu1 %v3952_v23 }
 0x666   : > { %3662 = vmatmul.mubr.msk.bf16.vlgmr.msra.gmra.mxu1 %vm939_vm2, %v2166_v18  ;;  %v2004_v18 = vsel %vm2003_vm6, -1e+25, %v3952_v23 }
 0x667   : > { %3667 = vmatprep.mubr.msk.bf16.mxu1 %vm3953_vm3, %v3952_v23 }
 0x708   : > { %v1868_v13 = vpop.f32.mrf.mxu1 }
 0x709   : > { %v1869_v22 = vadd.f32 %v4389_v11, %v1868_v13  ;;  %v2360_v13 = vrot.slane %v2004_v18, %v1142_v55 }
 0x70a   : > { %v3625_v19 = vpop.f32.mrf.mxu1 }
 0x70b   : > { %v1874_v20 = vmax.f32 %v1869_v22, 0.0 }
 0x70c   : > { %v1871_v21 = vpop.f32.mrf.mxu1 }
 0x70d   : > { %v1875_v24 = vpack.c.bf16 %v1874_v20, %v1874_v20 }
 0x70e   : > { %v3626_v27 = vpop.f32.mrf.mxu1 }
 0x70f   : > { %3644 = vmatmul.mubr.bf16.vlgmr.msra.gmra.mxu0 %v1875_v24 }
 0x710   : > { %3673 = vmatprep.mubr.msk.bf16.mxu0 %vm3953_vm3, %v3952_v23 }
 0x716   : > { %v3651_v28 = vpop.f32.mrf.mxu1 }
 0x717   : > { %v3429_v0 = vpack.c.bf16 %v3651_v28, %v3651_v28 }
 0x718   : > { %v2207_v29 = vpop.f32.mrf.mxu1 }
 0x719   : > { %v3427_v46 = vpack.c.bf16 %v2207_v29, %v2207_v29 }
 0x71a   : > { %v3652_v30 = vpop.f32.mrf.mxu1 }
 0x71b   : > { %v3430_v6 = vpack.c.bf16 %v3652_v30, %v3652_v30 }
 0x71c   : > { %v2210_v31 = vpop.f32.mrf.mxu1 }
 0x71d   : > { %v3428_v58 = vpack.c.bf16 %v2210_v31, %v2210_v31 }
 0x71e   : > { %v3657_v32 = vpop.f32.mrf.mxu1 }
 0x71f   : > { %v3433_v43 = vpack.c.bf16 %v3657_v32, %v3657_v32 }
 0x720   : > { %v2268_v34 = vpop.f32.mrf.mxu1 }
 0x721   : > { %v3431_v35 = vpack.c.bf16 %v2268_v34, %v2268_v34  ;;  %v2458_v48 = vsel %vm939_vm2, %v3433_v43, 0 }
 0x722   : > { %v3658_v36 = vpop.f32.mrf.mxu1 }
 0x723   : > { %v2366_v39 = vsel %vm939_vm2, %v3431_v35, 0  ;;  %v3434_v33 = vpack.c.bf16 %v3658_v36, %v3658_v36 }
 0x724   : > { %v2271_v40 = vpop.f32.mrf.mxu1  ;;  %3666 = vmatpush3.bf16.xpose.msra.mxu1 %v2366_v39 }
 0x725   : > { %v3432_v41 = vpack.c.bf16 %v2271_v40, %v2271_v40  ;;  %3677 = vmatprep.subr.bf16.mxu1 %v3952_v23  ;;  %v2504_v60 = vsel %vm939_vm2, %v3434_v33, 0 }
 0x726   : > { %v4396_v42 = vpop.f32.mrf.mxu1 }
 0x727   : > { %v2412_v2 = vsel %vm939_vm2, %v3432_v41, 0 }
 0x728   : > { %v2329_v45 = vpop.f32.mrf.mxu1  ;;  %3672 = vmatpush3.bf16.xpose.msra.mxu0 %v2412_v2 }
 0x729   : > { %3683 = vmatprep.subr.bf16.mxu0 %v3952_v23  ;;  %v3435_v61 = vpack.c.bf16 %v2329_v45, %v2329_v45 }
 0x72a   : > { %v4402_v49 = vpop.f32.mrf.mxu1 }
 0x72b   : > { %3668 = vmatmul.mubr.msk.bf16.vlgmr.msra.gmra.mxu1 %vm939_vm2, %v3427_v46  ;;  %v2610_v3 = vsel %vm946_vm1, %v3435_v61, 0 }
 0x72c   : > { %3678 = vmatpush3.bf16.xpose.msra.mxu1 %v2458_v48  ;;  %3679 = vmatprep.mubr.msk.bf16.mxu1 %vm3953_vm3, %v3952_v23  ;;  %v2332_v62 = vpop.f32.mrf.mxu1 }
 0x72d   : > { %3689 = vmatprep.subr.bf16.mxu1 %v3952_v23  ;;  %v3436_v5 = vpack.c.bf16 %v2332_v62, %v2332_v62 }
 0x72f   : > { %3674 = vmatmul.mubr.msk.bf16.vlgmr.msra.gmra.mxu0 %vm939_vm2, %v3428_v58  ;;  %v2656_v9 = vsel %vm946_vm1, %v3436_v5, 0 }
 0x730   : > { %3684 = vmatpush3.bf16.xpose.msra.mxu0 %v2504_v60  ;;  %3685 = vmatprep.mubr.msk.bf16.mxu0 %vm3953_vm3, %v3952_v23 }
 0x731   : > { %3695 = vmatprep.subr.bf16.mxu0 %v3952_v23 }
 0x733   : > { %3680 = vmatmul.mubr.msk.bf16.vlgmr.msra.gmra.mxu1 %vm939_vm2, %v3429_v0 }
 0x734   : > { %3690 = vmatpush3.bf16.msra.mxu1 %v2610_v3  ;;  %3691 = vmatprep.mubr.msk.bf16.mxu1 %vm3953_vm3, %v3952_v23 }
 0x735   : > { %3701 = vmatprep.subr.bf16.mxu1 %v3952_v23 }
 0x737   : > { %3686 = vmatmul.mubr.msk.bf16.vlgmr.msra.gmra.mxu0 %vm939_vm2, %v3430_v6 }
 0x738   : > { %3696 = vmatpush3.bf16.msra.mxu0 %v2656_v9  ;;  %3697 = vmatprep.mubr.msk.bf16.mxu0 %vm3953_vm3, %v3952_v23 }
 0x739   : > { %3707 = vmatprep.subr.bf16.mxu0 %v3952_v23 }
 0x7cf   : > { %v4422_v12 = vpop.f32.mrf.mxu0 }
 0x7d1   : > { %v3645_v14 = vpop.f32.mrf.mxu0 }
 0x7d3   : > { %v1967_v15 = vpop.f32.mrf.mxu0 }
 0x7d5   : > { %v3646_v16 = vpop.f32.mrf.mxu0 }
 0x7d6   : > { %v3437_v16 = vpack.c.bf16 %v4396_v42, %v4396_v42 }
 0x7eb   : > { %v2402_v22 = vpop.f32.mrf.mxu1 }
 0x7ec   : > { %v2403_v19 = vadd.f32 %v2402_v22, %v2360_v13  ;;  %v2702_v22 = vsel %vm946_vm1, %v3437_v16, 0 }
 0x7ed   : > { %v3669_v20 = vpop.f32.mrf.mxu1 }
 0x7ee   : > { %v2546_v21 = vsel %vm939_vm2, %v2403_v19, -inf }
 0x7ef   : > { %2547 = vmax.xlane.f32.xlu1 %v2546_v21  ;;  %v2405_v24 = vpop.f32.mrf.mxu1  ;;  %v2448_v27 = vpop.f32.mrf.mxu0 }
 0x7f0   : > { %v2449_v28 = vadd.f32 %v2448_v27, %v2360_v13 }
 0x7f1   : > { %v3670_v29 = vpop.f32.mrf.mxu1  ;;  %v3675_v30 = vpop.f32.mrf.mxu0 }
 0x7f2   : > { %v2549_v31 = vsel %vm939_vm2, %v2449_v28, -inf }
 0x7f3   : > { %v2494_v32 = vpop.f32.mrf.mxu1  ;;  %2550 = vmax.xlane.f32.xlu0 %v2549_v31  ;;  %v2451_v34 = vpop.f32.mrf.mxu0 }
 0x7f4   : > { %v2495_v35 = vadd.f32 %v2494_v32, %v2360_v13 }
 0x7f5   : > { %v3676_v36 = vpop.f32.mrf.mxu0  ;;  %v3681_v54 = vpop.f32.mrf.mxu1 }
 0x7f6   : > { %v2552_v55 = vsel %vm939_vm2, %v2495_v35, -inf }
 0x7f7   : > { %v2497_v39 = vpop.f32.mrf.mxu1  ;;  %2553 = vmax.xlane.f32.xlu0 %v2552_v55  ;;  %v2540_v40 = vpop.f32.mrf.mxu0 }
 0x7f8   : > { %v2541_v41 = vadd.f32 %v2540_v40, %v2360_v13 }
 0x7f9   : > { %v3682_v43 = vpop.f32.mrf.mxu1  ;;  %v3687_v2 = vpop.f32.mrf.mxu0 }
 0x7fa   : > { %v2555_v45 = vsel %vm939_vm2, %v2541_v41, -inf }
 0x7fb   : > { %2556 = vmax.xlane.f32.xlu0 %v2555_v45  ;;  %v2543_v46 = vpop.f32.mrf.mxu0 }
 0x7fd   : > { %v3688_v48 = vpop.f32.mrf.mxu0 }
 0x878   : > { %v2548_v33 = vpop.xlane.xlu1 %2547 }
 0x879   : > { %v2570_v58 = vsub.f32 %v2403_v19, %v2548_v33  ;;  %v3438_v19 = vpack.c.bf16 %v4402_v49, %v4402_v49  ;;  %v2558_v32 = vsub.f32 -inf, %v2548_v33 }
 0x87b   : > { %v2574_v60 = vmul.f32 1.442695, %v2570_v58  ;;  %v2748_v24 = vsel %vm946_vm1, %v3438_v19, 0 }
 0x87c   : > { %v2551_v61 = vpop.xlane.xlu0 %2550 }
 0x87d   : > { %v2571_v62 = vsub.f32 %v2449_v28, %v2551_v61  ;;  %3870 = vpow2.f32 %v2574_v60  ;;  %v2559_v34 = vsub.f32 -inf, %v2551_v61 }
 0x87f   : > { %v2576_v0 = vmul.f32 1.442695, %v2571_v62 }
 0x880   : > { %v2554_v3 = vpop.xlane.xlu0 %2553 }
 0x881   : > { %v2572_v5 = vsub.f32 %v2495_v35, %v2554_v3  ;;  %3872 = vpow2.f32 %v2576_v0  ;;  %v2564_v35 = vmul.f32 1.442695, %v2559_v34  ;;  %v2560_v36 = vsub.f32 -inf, %v2554_v3 }
 0x883   : > { %v2578_v6 = vmul.f32 1.442695, %v2572_v5  ;;  %v2566_v55 = vmul.f32 1.442695, %v2560_v36 }
 0x884   : > { %v2557_v9 = vpop.xlane.xlu0 %2556 }
 0x885   : > { %v2573_v14 = vsub.f32 %v2541_v41, %v2557_v9  ;;  %3874 = vpow2.f32 %v2578_v6  ;;  %v2561_v54 = vsub.f32 -inf, %v2557_v9 }
 0x887   : > { %v2580_v15 = vmul.f32 1.442695, %v2573_v14  ;;  %v2568_v39 = vmul.f32 1.442695, %v2561_v54 }
 0x889   : > { %3876 = vpow2.f32 %v2580_v15 }
 0x88a   : > { %v3871_v17 = vpop.eup %3870 }
 0x88b   : > { %v2586_v18 = vsel %vm939_vm2, %v3871_v17, 0.0  ;;  %v2602_v13 = vpack.c.bf16 %v3871_v17, %v3871_v17 }
 0x88c   : > { %2587 = vadd.xlane.f32.xlu0 %v2586_v18 }
 0x88d   : > { %3692 = vmatmul.mubr.msk.bf16.vlgmr.msra.gmra.mxu1 %vm939_vm2, %v2602_v13 }
 0x88e   : > { %v3873_v20 = vpop.eup %3872  ;;  %3702 = vmatpush3.bf16.msra.mxu1 %v2702_v22  ;;  %3703 = vmatprep.mubr.msk.bf16.mxu1 %vm3953_vm3, %v3952_v23 }
 0x88f   : > { %v2589_v42 = vsel %vm939_vm2, %v3873_v20, 0.0  ;;  %v2603_v21 = vpack.c.bf16 %v3873_v20, %v3873_v20  ;;  %3713 = vmatprep.subr.bf16.mxu1 %v3952_v23 }
 0x890   : > { %2590 = vadd.xlane.f32.xlu1 %v2589_v42 }
 0x891   : > { %3698 = vmatmul.mubr.msk.bf16.vlgmr.msra.gmra.mxu0 %vm939_vm2, %v2603_v21 }
 0x892   : > { %v3875_v27 = vpop.eup %3874  ;;  %3708 = vmatpush3.bf16.msra.mxu0 %v2748_v24  ;;  %3709 = vmatprep.mubr.msk.bf16.mxu0 %vm3953_vm3, %v3952_v23 }
 0x893   : > { %v2592_v49 = vsel %vm939_vm2, %v3875_v27, 0.0  ;;  %v2604_v28 = vpack.c.bf16 %v3875_v27, %v3875_v27  ;;  %3719 = vmatprep.subr.bf16.mxu0 %v3952_v23 }
 0x894   : > { %2593 = vadd.xlane.f32.xlu1 %v2592_v49 }
 0x895   : > { %3704 = vmatmul.mubr.msk.bf16.vlgmr.msra.gmra.mxu1 %vm939_vm2, %v2604_v28 }
 0x896   : > { %v3877_v29 = vpop.eup %3876  ;;  %3714 = vmatpush3.bf16.msra.mxu1 %v4254_v59  ;;  %3715 = vmatprep.mubr.msk.bf16.mxu1 %vm3953_vm3, %v3952_v23  ;;  %v2562_v59 = vmul.f32 1.442695, %v2558_v32 }
 0x897   : > { %v2595_v30 = vsel %vm939_vm2, %v3877_v29, 0.0  ;;  %v2605_v31 = vpack.c.bf16 %v3877_v29, %v3877_v29  ;;  %3725 = vmatprep.subr.bf16.mxu1 %v3952_v23 }
 0x898   : > { %2596 = vadd.xlane.f32.xlu0 %v2595_v30  ;;  %3878 = vpow2.f32 %v2562_v59 }
 0x899   : > { %3710 = vmatmul.mubr.msk.bf16.vlgmr.msra.gmra.mxu0 %vm939_vm2, %v2605_v31  ;;  %3880 = vpow2.f32 %v2564_v35 }
 0x89a   : > { %3720 = vmatpush3.bf16.msra.mxu0 %v4248_v57  ;;  %3721 = vmatprep.mubr.msk.bf16.mxu0 %vm3953_vm3, %v3952_v23  ;;  %3882 = vpow2.f32 %v2566_v55 }
 0x89b   : > { %3731 = vmatprep.subr.bf16.mxu0 %v3952_v23  ;;  %3884 = vpow2.f32 %v2568_v39 }
 0x8a5   : > { %v3879_v40 = vpop.eup %3878 }
 0x8a6   : > { %v2582_v57 = vmul.f32 0.0, %v3879_v40  ;;  %v3881_v43 = vpop.eup %3880 }
 0x8a7   : > { %v2583_v46 = vmul.f32 0.0, %v3881_v43  ;;  %v3883_v33 = vpop.eup %3882 }
 0x8a8   : > { %v3885_v58 = vpop.eup %3884  ;;  %v2584_v61 = vmul.f32 0.0, %v3883_v33 }
 0x8a9   : > { %v2585_v3 = vmul.f32 0.0, %v3885_v58 }
 0x915   : > { %v2588_v41 = vpop.xlane.xlu0 %2587 }
 0x916   : > { %v2598_v2 = vadd.f32 %v2588_v41, %v2582_v57 }
 0x918   : > { %3886 = vrcp.f32 %v2598_v2 }
 0x919   : > { %v2591_v45 = vpop.xlane.xlu1 %2590 }
 0x91a   : > { %v2599_v48 = vadd.f32 %v2591_v45, %v2583_v46 }
 0x91c   : > { %3888 = vrcp.f32 %v2599_v48 }
 0x91d   : > { %v2594_v60 = vpop.xlane.xlu1 %2593 }
 0x91e   : > { %v2600_v0 = vadd.f32 %v2594_v60, %v2584_v61 }
 0x920   : > { %3890 = vrcp.f32 %v2600_v0 }
 0x921   : > { %v2597_v62 = vpop.xlane.xlu0 %2596 }
 0x922   : > { %v2601_v5 = vadd.f32 %v2597_v62, %v2585_v3 }
 0x924   : > { %3892 = vrcp.f32 %v2601_v5 }
 0x925   : > { %v3887_v14 = vpop.eup %3886 }
 0x929   : > { %v3889_v19 = vpop.eup %3888 }
 0x92d   : > { %v3891_v31 = vpop.eup %3890 }
 0x931   : > { %v3893_v35 = vpop.eup %3892 }
 0x94d   : > { %v2646_v6 = vpop.f32.mrf.mxu1 }
 0x94e   : > { %v2790_v9 = vadd.f32 %v2646_v6, %v2582_v57 }
 0x94f   : > { %v3693_v15 = vpop.f32.mrf.mxu1 }
 0x950   : > { %v2798_v16 = vmul.f32 %v3887_v14, %v2790_v9 }
 0x951   : > { %v2649_v17 = vpop.f32.mrf.mxu1  ;;  %v2692_v18 = vpop.f32.mrf.mxu0 }
 0x952   : > { %v2802_v13 = vpack.c.bf16 %v2798_v16, %v2798_v16  ;;  %v2791_v22 = vadd.f32 %v2692_v18, %v2583_v46 }
 0x953   : > { %v3694_v20 = vpop.f32.mrf.mxu1  ;;  %v3699_v42 = vpop.f32.mrf.mxu0 }
 0x954   : > { %v2799_v21 = vmul.f32 %v3889_v19, %v2791_v22  ;;  %3722 = vmatmul.mubr.msk.bf16.vlgmr.msra.gmra.mxu0 %vm939_vm2, %v2802_v13 }
 0x955   : > { %v2695_v24 = vpop.f32.mrf.mxu0  ;;  %v2738_v27 = vpop.f32.mrf.mxu1  ;;  %3732 = vmatpush3.bf16.msra.mxu0 %v4260_v38  ;;  %3733 = vmatprep.mubr.msk.bf16.mxu0 %vm3953_vm3, %v3952_v23 }
 0x956   : > { %v2803_v49 = vpack.c.bf16 %v2799_v21, %v2799_v21  ;;  %v2792_v28 = vadd.f32 %v2738_v27, %v2584_v61  ;;  %3745 = vmatprep.subr.bf16.mxu0 %v3952_v23 }
 0x957   : > { %v3700_v29 = vpop.f32.mrf.mxu0  ;;  %v3705_v30 = vpop.f32.mrf.mxu1 }
 0x958   : > { %3716 = vmatmul.mubr.msk.bf16.vlgmr.msra.gmra.mxu1 %vm939_vm2, %v2803_v49  ;;  %v2800_v38 = vmul.f32 %v3891_v31, %v2792_v28  ;;  %v3374_v29 = vld [vmem:[%s724_s16] ss:$0 sm:$0xff]  ;;  %s3109_s16 = sshll.u32 %s3954_s23, 4  ;;  %s3110_s16 = int_to_ptr.vmem [resolvable:$true] %s3109_s16 }
 0x959   : > { %v2741_v32 = vpop.f32.mrf.mxu1  ;;  %v2784_v59 = vpop.f32.mrf.mxu0  ;;  %3726 = vmatpush3.bf16.msra.mxu1 %v4269_v47  ;;  %3727 = vmatprep.mubr.msk.bf16.mxu1 %vm3953_vm3, %v3952_v23  ;;  %s3900_s1 = scalar_lea.vmem %s3110_s16, 256  ;;  %p3907_p10 = scmp.lt.s32.totalorder %s3110_s16, %s3110_s16 }
 0x95a   : > { %v2793_v34 = vadd.f32 %v2784_v59, %v2585_v3  ;;  %3737 = vmatprep.subr.bf16.mxu1 %v3952_v23  ;;  %v2890_v40 = vpack.c.bf16 %v2800_v38, %v2800_v38  ;;  %v3375_v32 = vld [vmem:[%s727_s9] ss:$0 sm:$0xff]  ;;  %s4599_s9 = sld [smem:[#allocation7_spill]]  ;;  %p3901_p7 = scmp.ne.s32.totalorder %s3110_s16, %s3900_s1 }
 0x95b   : > { %v3706_v36 = vpop.f32.mrf.mxu1  ;;  %v3711_v54 = vpop.f32.mrf.mxu0  ;;  %p3908_p11 = scmp.lt.s32.totalorder %s3900_s1, %s3900_s1 }
 0x95c   : > { %v2801_v55 = vmul.f32 %v3893_v35, %v2793_v34 }
 0x95d   : > { %v2787_v39 = vpop.f32.mrf.mxu0  ;;  %p3909_p12 = por %p3908_p11, %p3907_p10 }
 0x95e   : > { %v2935_v41 = vpack.c.bf16 %v2801_v55, %v2801_v55 }
 0x95f   : > { %v3712_v57 = vpop.f32.mrf.mxu0 }
 0x960   : > { %3728 = vmatmul.mubr.msk.bf16.vlgmr.msra.gmra.mxu1 %vm939_vm2, %v2890_v40  ;;  %3734 = vmatmul.mubr.msk.bf16.vlgmr.msra.gmra.mxu0 %vm939_vm2, %v2935_v41  ;;  %s4600_s19 = sadd.s32 4294967295, %s4599_s9  }
 0x961   : > { %3738 = vmatpush3.bf16.msra.mxu1 %v4297_v26  ;;  %3741 = vmatprep.mubr.msk.bf16.mxu1 %vm3953_vm3, %v3952_v23  ;;  %p4528_p6 = scmp.eq.s32.totalorder %s4600_s19, 1 }
 0x962   : > { %3739 = vmatprep.subr.bf16.mxu1 %v3952_v23  ;;  %3746 = vmatpush3.bf16.msra.mxu0 %v4308_v50 }
 0x963   : > { %3747 = vmatprep.subr.bf16.mxu0 %v3952_v23  ;;  %3761 = vmatprep.mubr.msk.bf16.mxu0 %vm3953_vm3, %v3952_v23  ;;  %p3902_p8 = pnand %p3901_p7, %p4528_p6 }
 0x965   : > { %3740 = vmatpush3.bf16.msra.mxu1 %v4301_v44  ;;  %p3903_p9 = pneg %p3902_p8 }
 0x966   : > { %3748 = vmatpush3.bf16.msra.mxu0 %v4312_v51 }
 0x967   : > { %3749 = vmatprep.subr.bf16.mxu0 %v3952_v23  ;;  %p3910_p13 = pnand %p3909_p12, %p3903_p9 }
 0x96a   : > { %3750 = vmatpush3.bf16.msra.mxu0 %v4317_v52 }
 0x96b   : > { %3751 = vmatprep.subr.bf16.mxu0 %v3952_v23 }
 0x96e   : > { %3752 = vmatpush3.bf16.msra.mxu0 %v4322_v7 }
 0x96f   : > { %3753 = vmatprep.subr.bf16.mxu0 %v3952_v23 }
 0x972   : > { %3754 = vmatpush3.bf16.msra.mxu0 %v4327_v53 }
 0x973   : > { %3755 = vmatprep.subr.bf16.mxu0 %v3952_v23 }
 0x976   : > { %3756 = vmatpush3.bf16.msra.mxu0 %v4332_v56 }
 0x977   : > { %3757 = vmatprep.subr.bf16.mxu0 %v3952_v23 }
 0x97a   : > { %3758 = vmatpush3.bf16.msra.mxu0 %v4375_v10  ;;  %v3365_v10 = vld [vmem:[%s721_s28] ss:$0 sm:$0xff] }
 0x97b   : > { %3759 = vmatprep.subr.bf16.mxu0 %v3952_v23  ;;  %v1965_v58 = vadd.f32 %v3365_v10, %v4422_v12 }
 0x97d   : > { %v1970_v5 = vadd.f32 %v1965_v58, %v4353_v4 }
 0x97e   : > { %3760 = vmatpush3.bf16.msra.mxu0 %v4380_v8 }
 0x97f   : > { %v1971_v6 = vsel %vm1783_vm5, %v1970_v5, 0.0 }
 0xa14   : > { %v2884_v47 = vpop.f32.mrf.mxu0 }
 0xa16   : > { %v3723_v26 = vpop.f32.mrf.mxu0 }
 0xa18   : > { %v2841_v44 = vpop.f32.mrf.mxu1  ;;  %v2887_v50 = vpop.f32.mrf.mxu0 }
 0xa19   : > { %v2885_v43 = vadd.f32 %v2884_v47, %v2841_v44 }
 0xa1a   : > { %v3717_v51 = vpop.f32.mrf.mxu1  ;;  %v3724_v52 = vpop.f32.mrf.mxu0 }
 0xa1c   : > { %v2844_v7 = vpop.f32.mrf.mxu1 }
 0xa1e   : > { %v3718_v53 = vpop.f32.mrf.mxu1 }
 0xa20   : > { %v2928_v2 = vpop.f32.mrf.mxu1  ;;  %v2973_v56 = vpop.f32.mrf.mxu0 }
 0xa21   : > { %v2934_v45 = vadd.f32 %v2928_v2, %v2885_v43 }
 0xa22   : > { %v3729_v23 = vpop.f32.mrf.mxu1  ;;  %v3735_v46 = vpop.f32.mrf.mxu0 }
 0xa23   : > { %v2979_v8 = vadd.f32 %v2973_v56, %v2934_v45 }
 0xa24   : > { %v2931_v48 = vpop.f32.mrf.mxu1  ;;  %v2976_v33 = vpop.f32.mrf.mxu0 }
 0xa25   : > { %v2980_v60 = vadd.f32 %v4287_v25, %v2979_v8 }
 0xa26   : > { %v3730_v61 = vpop.f32.mrf.mxu1  ;;  %v3736_v62 = vpop.f32.mrf.mxu0 }
 0xa27   : > { %v2981_v0 = vadd.f32 %v2980_v60, %v4292_v37 }
 0xa29   : > { %v2982_v3 = vsel %vm1783_vm5, %v2981_v0, 0.0 }
 0xa2a   : > { %2983 = vadd.xlane.f32.xlu1 %v2982_v3 }
 0xa2e   : > { %1972 = vadd.xlane.f32.xlu1 %v1971_v6 }
 0xab3   : > { %v2984_v9 = vpop.xlane.xlu1 %2983 }
 0xab4   : > { %v2985_v14 = vmul.f32 0.03125, %v2984_v9 }
 0xab6   : > { %v2986_v15 = vsub.f32 %v2981_v0, %v2985_v14 }
 0xab7   : > { %v1973_v16 = vpop.xlane.xlu1 %1972 }
 0xab8   : > { %v1974_v17 = vmul.f32 0.03125, %v1973_v16  ;;  %v2987_v12 = vmul.f32 %v2986_v15, %v2986_v15 }
 0xaba   : > { %v1975_v18 = vsub.f32 %v1970_v5, %v1974_v17  ;;  %v2988_v25 = vsel %vm1783_vm5, %v2987_v12, 0.0 }
 0xabb   : > { %2989 = vadd.xlane.f32.xlu0 %v2988_v25 }
 0xabc   : > { %v1976_v37 = vmul.f32 %v1975_v18, %v1975_v18 }
 0xabe   : > { %v1977_v13 = vsel %vm1783_vm5, %v1976_v37, 0.0 }
 0xabf   : > { %1978 = vadd.xlane.f32.xlu1 %v1977_v13 }
 0xb44   : > { %v2990_v4 = vpop.xlane.xlu0 %2989 }
 0xb45   : > { %v2991_v22 = vmul.f32 0.03125, %v2990_v4 }
 0xb47   : > { %v2992_v19 = vadd.f32 1e-05, %v2991_v22 }
 0xb48   : > { %v1979_v20 = vpop.xlane.xlu1 %1978 }
 0xb49   : > { %3894 = vrsqrt.f32 %v2992_v19  ;;  %v1980_v42 = vmul.f32 0.03125, %v1979_v20 }
 0xb4b   : > { %v1981_v21 = vadd.f32 1e-05, %v1980_v42 }
 0xb4d   : > { %3896 = vrsqrt.f32 %v1981_v21 }
 0xb56   : > { %v3895_v24 = vpop.eup %3894 }
 0xb57   : > { %v2994_v27 = vmul.f32 %v3895_v24, %v2986_v15 }
 0xb59   : > { %v2995_v49 = vmul.f32 %v4342_v63, %v2994_v27 }
 0xb5a   : > { %v3897_v28 = vpop.eup %3896 }
 0xb5b   : > { %v1983_v30 = vmul.f32 %v3897_v28, %v1975_v18  ;;  %v2996_v31 = vadd.f32 %v4349_v1, %v2995_v49 }
 0xb5d   : > { %v2997_v59 = vpack.c.bf16 %v2996_v31, %v2996_v31  ;;  %v1990_v38 = vmul.f32 %v3374_v29, %v1983_v30 }
 0xb5f   : > { %3742 = vmatmul.mubr.msk.bf16.vlgmr.msra.gmra.mxu1 %vm1783_vm5, %v2997_v59  ;;  %v1997_v34 = vadd.f32 %v3375_v32, %v1990_v38 }
 0xb61   : > { %1998 = vst.msk [vmem:[#allocation2] sm:$0xff] %vm1783_vm5, %v1997_v34 }
 0xc1f   : > { %v3035_v63 = vpop.f32.mrf.mxu1 }
 0xc20   : > { %v3036_v35 = vadd.f32 %v4389_v11, %v3035_v63 }
 0xc21   : > { %v3743_v36 = vpop.f32.mrf.mxu1 }
 0xc22   : > { %v3041_v54 = vmax.f32 %v3036_v35, 0.0 }
 0xc23   : > { %v3038_v55 = vpop.f32.mrf.mxu1 }
 0xc24   : > { %v3042_v39 = vpack.c.bf16 %v3041_v54, %v3041_v54 }
 0xc25   : > { %v3744_v1 = vpop.f32.mrf.mxu1 }
 0xc26   : > { %3762 = vmatmul.mubr.bf16.vlgmr.msra.gmra.mxu0 %v3042_v39 }
 0xce6   : > { %v3077_v40 = vpop.f32.mrf.mxu0 }
 0xce7   : > { %v3078_v41 = vadd.f32 %v3365_v10, %v3077_v40 }
 0xce8   : > { %v3763_v57 = vpop.f32.mrf.mxu0 }
 0xce9   : > { %v3083_v47 = vadd.f32 %v3078_v41, %v2996_v31 }
 0xcea   : > { %v3080_v26 = vpop.f32.mrf.mxu0 }
 0xceb   : > { %v3084_v44 = vsel %vm1783_vm5, %v3083_v47, 0.0 }
 0xcec   : > { %3085 = vadd.xlane.f32.xlu0 %v3084_v44  ;;  %v3764_v50 = vpop.f32.mrf.mxu0 }
 0xd75   : > { %v3086_v51 = vpop.xlane.xlu0 %3085 }
 0xd76   : > { %v3087_v52 = vmul.f32 0.03125, %v3086_v51 }
 0xd78   : > { %v3088_v7 = vsub.f32 %v3083_v47, %v3087_v52 }
 0xd7a   : > { %v3089_v11 = vmul.f32 %v3088_v7, %v3088_v7 }
 0xd7c   : > { %v3090_v53 = vsel %vm1783_vm5, %v3089_v11, 0.0 }
 0xd7d   : > { %3091 = vadd.xlane.f32.xlu0 %v3090_v53 }
 0xe06   : > { %v3092_v43 = vpop.xlane.xlu0 %3091 }
 0xe07   : > { %v3093_v2 = vmul.f32 0.03125, %v3092_v43 }
 0xe09   : > { %v3094_v56 = vadd.f32 1e-05, %v3093_v2 }
 0xe0b   : > { %3898 = vrsqrt.f32 %v3094_v56 }
 0xe18   : > { %v3899_v45 = vpop.eup %3898 }
 0xe19   : > { %v3096_v10 = vmul.f32 %v3899_v45, %v3088_v7 }
 0xe1b   : > { %v3097_v23 = vmul.f32 %v3374_v29, %v3096_v10 }
 0xe1d   : > { %v3098_v46 = vadd.f32 %v3375_v32, %v3097_v23 }
 0xe1f   : > { %3099 = vst.msk [vmem:[#allocation2 + $0x8] sm:$0xff] %vm1783_vm5, %v3098_v46 }
 0xe20   : > { %3913 = shalt.err (!%p3910_p13)
}
 0xe21   : > { %s3955_s4 = smov 128   ;;  %s3956_s27 = smov 8  }
 0xe22   : > { %s4602_s14 = sld [smem:[#allocation15_spill]] }
 0xe28   : > { %3772 = dma.vmem_to_hbm [thread:$0]  (%p4528_p6), %s3110_s16, 256, %s4602_s14, [#allocation3], %s3955_s4, %s3955_s4, %s3956_s27  }
 0xe29   : > { %3937 = dma.done.wait (%p4528_p6), [#allocation3], 256  }
 0xe2a   : > { %3939 = vsyncadd (%p4528_p6), [#allocation3], 4294967040 }
 0xe2b PF: > { %s4603_s18 = sld [smem:[#allocation7_spill]] }
 0xe2c   : > { %s4605_s19 = sld [smem:[#allocation8_spill]] }
 0xe31   : > { %s26_s20 = sadd.s32 1, %s4603_s18   ;;  %s4604_s18 = sld [smem:[#allocation6_spill]] }
 0xe32   : > { %p23_p0 = scmp.ge.s32.totalorder %s26_s20, 4  }
 0xe34   :  { %25 = sbr.rel (!%p23_p0) target bundleno = 10 (0xa), region = 156 }
 0xe39   :  { %3125 = vsyncpa [#allocation3], 1 }
 0xe3a   :  { %3127 = vsyncpa [#allocation3 + $0x1], 1 }

</bundles_post_ra>
